<compile_context>
chip_gen: v7x
topology: tpu7x:2x2x1
jax: 0.10.0
libtpu: 0.0.40
codegen_flags: <defaults>
</compile_context>

<pallas_src>
import functools

import jax
import jax.numpy as jnp
from jax.experimental import pallas as pl
from jax.experimental.pallas import tpu as pltpu

NEG_SLOPE = 0.2
BN_EPS = 1e-5


def _vmem_capacity_bytes():
    try:
        info = pltpu.get_tpu_info()
        return int(getattr(info, "vmem_capacity_bytes", 64 * 1024 * 1024))
    except Exception:  # pragma: no cover - conservative fallback
        return 64 * 1024 * 1024


_VMEM_CAP = _vmem_capacity_bytes()
# ~75% of physical VMEM: 96 MiB on v5e/v6e (128 MiB), 48 MiB on v7x (64 MiB).
VMEM_LIMIT = max(32 * 1024 * 1024, min(_VMEM_CAP * 3 // 4, 100 * 1024 * 1024))


def _pick_tile(n, target):
    """Largest multiple-of-16 divisor of n that is <= target (else n itself).

    Multiple of 16 keeps bf16 sublane packing / reshapes relayout-free.
    """
    for t in sorted({target, 1024, 512, 384, 256, 128, 64, 32, 16}, reverse=True):
        if t <= n and n % t == 0 and t % 16 == 0:
            return t
    return n


# ----------------------------------------------------------------------------
# Pallas kernels
# ----------------------------------------------------------------------------
def _edge_conv_max_kernel(nbr_ref, ctr_ref, wt_ref, wd_ref, scale_ref,
                          shift_ref, o_ref):
    """EdgeConv: 1x1 conv + folded BN + LeakyReLU + max over K neighbors.

    nbr_ref : (K, TP, C)  bf16 gathered neighbor features for this point tile
    ctr_ref : (TP, C)     bf16 center (per-point) features
    wt_ref  : (C, Cout)   bf16 top half of the conv weight (acts on nbr - ctr),
                          pre-multiplied by sign(BN scale)
    wd_ref  : (C, Cout)   bf16 (bottom - top) half (acts on ctr), sign-folded
    scale/shift : (1, Cout) f32 folded BN affine; scale >= 0 by construction
    o_ref   : (TP, Cout)  bf16 max over the K neighbors
    """
    k, tp, c = nbr_ref.shape
    cout = wt_ref.shape[1]
    wt = wt_ref[...]

    # Center contribution, shared by all K neighbors of a point (hoisted).
    cterm = jnp.dot(ctr_ref[...], wd_ref[...],
                    preferred_element_type=jnp.float32)            # (TP, Cout)

    def chunk_max(start, size):
        # One MXU matmul over `size` neighbors, immediately reduced to a max so
        # the f32 intermediate stays bounded at size*TP*Cout.
        blk = nbr_ref[pl.ds(start, size), :, :]                    # (size, TP, C)
        proj = jnp.dot(blk.reshape(size * tp, c), wt,
                       preferred_element_type=jnp.float32)         # (size*TP, Cout)
        return jnp.max(proj.reshape(size, tp, cout), axis=0)       # (TP, Cout)

    k_chunk = min(4, k)
    n_chunks = k // k_chunk
    rem = k - n_chunks * k_chunk

    run_max = chunk_max(0, k_chunk)
    if n_chunks > 1:
        def body(i, m):
            return jnp.maximum(m, chunk_max(i * k_chunk, k_chunk))
        run_max = jax.lax.fori_loop(1, n_chunks, body, run_max)
    if rem > 0:
        run_max = jnp.maximum(run_max, chunk_max(n_chunks * k_chunk, rem))

    # Because sign(scale) was folded into wt/wd, scale >= 0 here, so the K-max
    # commutes exactly with the monotone affine + LeakyReLU below.
    y = (run_max + cterm) * scale_ref[...] + shift_ref[...]
    y = jnp.maximum(y, NEG_SLOPE * y)                              # LeakyReLU
    o_ref[...] = y.astype(o_ref.dtype)


def _conv5_pool_kernel(x1_ref, x2_ref, x3_ref, x4_ref,
                       w1_ref, w2_ref, w3_ref, w4_ref,
                       scale_ref, shift_ref, o_ref, max_sc, sum_sc, *, inv_n):
    """Conv1d(512->emb, k=1) + BN + LeakyReLU with streaming max & mean pooling.

    Takes x1..x4 separately plus the matching slices of the conv5 weight so the
    (B, N, 512) concat never hits HBM.
    x*_ref : (1, TN, Ci) bf16 one point tile of one batch element
    o_ref  : (1, 2, emb) f32  row 0 = max pool over N, row 1 = mean pool over N
    """
    step = pl.program_id(1)

    @pl.when(step == 0)
    def _():
        max_sc[...] = jnp.full(max_sc.shape, -jnp.inf, jnp.float32)
        sum_sc[...] = jnp.zeros(sum_sc.shape, jnp.float32)

    y = jnp.dot(x1_ref[0], w1_ref[...], preferred_element_type=jnp.float32)
    y += jnp.dot(x2_ref[0], w2_ref[...], preferred_element_type=jnp.float32)
    y += jnp.dot(x3_ref[0], w3_ref[...], preferred_element_type=jnp.float32)
    y += jnp.dot(x4_ref[0], w4_ref[...], preferred_element_type=jnp.float32)
    y = y * scale_ref[...] + shift_ref[...]
    y = jnp.maximum(y, NEG_SLOPE * y)
    max_sc[...] = jnp.maximum(max_sc[...], jnp.max(y, axis=0, keepdims=True))
    sum_sc[...] = sum_sc[...] + jnp.sum(y, axis=0, keepdims=True)

    @pl.when(step == pl.num_programs(1) - 1)
    def _():
        o_ref[0] = jnp.concatenate([max_sc[...], sum_sc[...] * inv_n], axis=0)


def _head_kernel(x_ref, w1_ref, s1_ref, t1_ref, w2_ref, s2_ref, t2_ref,
                 w3_ref, b3_ref, o_ref):
    """Fused head: (lin1+BN+LeakyReLU) -> (lin2+bias+BN+LeakyReLU) -> (lin3+bias)."""
    h = jnp.dot(x_ref[...], w1_ref[...], preferred_element_type=jnp.float32)
    h = h * s1_ref[...] + t1_ref[...]
    h = jnp.maximum(h, NEG_SLOPE * h)
    # TODO(synk): nn.Dropout is identity in eval mode; training dropout not modeled.
    h = jnp.dot(h.astype(w2_ref.dtype), w2_ref[...],
                preferred_element_type=jnp.float32)
    h = h * s2_ref[...] + t2_ref[...]
    h = jnp.maximum(h, NEG_SLOPE * h)
    h = jnp.dot(h.astype(w3_ref.dtype), w3_ref[...],
                preferred_element_type=jnp.float32)
    o_ref[...] = h + b3_ref[...]


# ----------------------------------------------------------------------------
# pallas_call wrappers
# ----------------------------------------------------------------------------
def edge_conv_max(nbr, ctr, wt, wd, scale, shift, *, tile_p=512):
    K, P, C = nbr.shape
    Cout = wt.shape[1]
    TP = _pick_tile(P, tile_p)
    return pl.pallas_call(
        _edge_conv_max_kernel,
        out_shape=jax.ShapeDtypeStruct((P, Cout), jnp.bfloat16),
        grid=(P // TP,),
        in_specs=[
            pl.BlockSpec((K, TP, C), lambda i: (0, i, 0)),
            pl.BlockSpec((TP, C), lambda i: (i, 0)),
            pl.BlockSpec((C, Cout), lambda i: (0, 0)),
            pl.BlockSpec((C, Cout), lambda i: (0, 0)),
            pl.BlockSpec((1, Cout), lambda i: (0, 0)),
            pl.BlockSpec((1, Cout), lambda i: (0, 0)),
        ],
        out_specs=pl.BlockSpec((TP, Cout), lambda i: (i, 0)),
        compiler_params=pltpu.CompilerParams(
            dimension_semantics=("parallel",),
            vmem_limit_bytes=VMEM_LIMIT),
    )(nbr, ctr, wt, wd, scale, shift)


def conv5_pool(feats, w_parts, scale, shift, *, tile_n=1024):
    """feats: 4x (B, N, Ci) bf16; w_parts: 4x (Ci, emb) bf16 slices of conv5."""
    B, N, _ = feats[0].shape
    emb = w_parts[0].shape[1]
    TN = _pick_tile(N, tile_n)
    kern = functools.partial(_conv5_pool_kernel, inv_n=1.0 / N)
    in_specs = (
        [pl.BlockSpec((1, TN, f.shape[-1]), lambda b, n: (b, n, 0)) for f in feats]
        + [pl.BlockSpec(w.shape, lambda b, n: (0, 0)) for w in w_parts]
        + [pl.BlockSpec((1, emb), lambda b, n: (0, 0)),
           pl.BlockSpec((1, emb), lambda b, n: (0, 0))])
    # TODO(synk): when B == 1 on v7x, split N into an outer "parallel" chunk axis
    # with partial pools + a tiny second pass so both TensorCores stay busy.
    return pl.pallas_call(
        kern,
        out_shape=jax.ShapeDtypeStruct((B, 2, emb), jnp.float32),
        grid=(B, N // TN),
        in_specs=in_specs,
        out_specs=pl.BlockSpec((1, 2, emb), lambda b, n: (b, 0, 0)),
        scratch_shapes=[pltpu.VMEM((1, emb), jnp.float32),
                        pltpu.VMEM((1, emb), jnp.float32)],
        compiler_params=pltpu.CompilerParams(
            dimension_semantics=("parallel", "arbitrary"),
            vmem_limit_bytes=VMEM_LIMIT),
    )(*feats, *w_parts, scale, shift)


def head_mlp(x, params):
    B = x.shape[0]
    out_c = params['wl3'].shape[1]
    args = (x,
            params['wl1'], params['ln1'][0], params['ln1'][1],
            params['wl2'], params['ln2'][0], params['ln2'][1],
            params['wl3'], params['b3'])
    in_specs = [pl.BlockSpec(a.shape, lambda i, nd=a.ndim: (0,) * nd)
                for a in args]
    return pl.pallas_call(
        _head_kernel,
        out_shape=jax.ShapeDtypeStruct((B, out_c), jnp.float32),
        grid=(1,),
        in_specs=in_specs,
        out_specs=pl.BlockSpec((B, out_c), lambda i: (0, 0)),
        compiler_params=pltpu.CompilerParams(vmem_limit_bytes=VMEM_LIMIT),
    )(*args)


# ----------------------------------------------------------------------------
# JAX glue: knn + neighbor gather (matches the PyTorch reference semantics)
# ----------------------------------------------------------------------------
def knn_idx(f, k):
    """f: (B, N, C) -> indices of k nearest neighbors (B, N, k), self included."""
    # TODO(synk): O(N^2) pairwise distances + exact top_k stay in XLA; a Pallas
    # tiled-distance + streaming partial top-k (or lax.approx_max_k) is the next
    # step for large N.
    inner = jnp.einsum('bic,bjc->bij', f, f,
                       preferred_element_type=jnp.float32)   # bf16 MXU, f32 acc
    f32 = f.astype(jnp.float32)
    sq = jnp.sum(f32 * f32, axis=-1)
    neg_d2 = 2.0 * inner - sq[:, :, None] - sq[:, None, :]
    _, idx = jax.lax.top_k(neg_d2, k)          # largest of -d^2 == nearest
    return idx


def gather_neighbors(f, idx):
    """Gather neighbor rows neighbor-major: (K, B*N, C) bf16 + centers (B*N, C) bf16."""
    # TODO(synk): fusing this gather into the edge-conv kernel (VMEM-resident
    # per-batch feature table + vectorized in-kernel row gather) would remove the
    # K-times edge-tensor HBM round trip; kept in XLA for guaranteed lowering.
    B, N, C = f.shape
    K = idx.shape[-1]
    f_flat = f.reshape(B * N, C).astype(jnp.bfloat16)
    gidx = (idx + (jnp.arange(B) * N)[:, None, None]).reshape(B * N, K).T
    nbr = f_flat[gidx]                          # (K, B*N, C), neighbor-major
    return nbr, f_flat


# ----------------------------------------------------------------------------
# Parameters (deterministic, synthetic) and BN folding
# ----------------------------------------------------------------------------
def fold_bn(gamma, beta, mean, var):
    scale = gamma / jnp.sqrt(var + BN_EPS)
    shift = beta - mean * scale
    return scale[None, :].astype(jnp.float32), shift[None, :].astype(jnp.float32)


def init_params(key, emb_dims, output_channels):
    keys = jax.random.split(key, 20)

    def w(kk, cin, cout):
        return (jax.random.normal(kk, (cin, cout), jnp.float32) /
                jnp.sqrt(jnp.float32(cin)))

    def bn(kk, c):
        gamma = 1.0 + 0.1 * jax.random.normal(kk, (c,), jnp.float32)
        beta = jnp.zeros((c,), jnp.float32)
        mean = jnp.zeros((c,), jnp.float32)
        var = jnp.ones((c,), jnp.float32)
        return fold_bn(gamma, beta, mean, var)

    def split_conv(kk, c, cout, pad_to=None):
        full = w(kk, 2 * c, cout)               # conv weight over [nbr-ctr, ctr]
        wt, wb = full[:c], full[c:]
        wd = wb - wt
        if pad_to is not None and pad_to > c:   # pad contraction dim for layout
            pad = ((0, pad_to - c), (0, 0))
            wt = jnp.pad(wt, pad)
            wd = jnp.pad(wd, pad)
        return wt, wd

    def edge_params(kw, kb, c, cout, pad_to=None):
        wt, wd = split_conv(kw, c, cout, pad_to)
        scale, shift = bn(kb, cout)
        # Fold sign(BN scale) into the weight columns so scale becomes >= 0 and
        # the K-max can be hoisted in front of the affine + LeakyReLU exactly.
        sgn = jnp.sign(scale)                   # (1, cout), +/-1 (exact in bf16)
        wt = (wt * sgn).astype(jnp.bfloat16)
        wd = (wd * sgn).astype(jnp.bfloat16)
        return wt, wd, (jnp.abs(scale), shift)

    p = {}
    p['wt1'], p['wd1'], p['bn1'] = edge_params(keys[0], keys[1], 3, 64, pad_to=8)
    p['wt2'], p['wd2'], p['bn2'] = edge_params(keys[2], keys[3], 64, 64)
    p['wt3'], p['wd3'], p['bn3'] = edge_params(keys[4], keys[5], 64, 128)
    p['wt4'], p['wd4'], p['bn4'] = edge_params(keys[6], keys[7], 128, 256)
    # conv5 weight pre-split into the four channel groups (x1|x2|x3|x4).
    w5 = w(keys[8], 512, emb_dims).astype(jnp.bfloat16)
    p['w5_parts'] = (w5[:64], w5[64:128], w5[128:256], w5[256:512])
    p['bn5'] = bn(keys[9], emb_dims)
    p['wl1'] = w(keys[10], emb_dims * 2, 512).astype(jnp.bfloat16)
    p['ln1'] = bn(keys[11], 512)
    # linear2 has a bias; fold it into the BN7 affine shift.
    p['wl2'] = w(keys[12], 512, 256).astype(jnp.bfloat16)
    b2 = 0.01 * jax.random.normal(keys[13], (256,), jnp.float32)
    s2, sh2 = bn(keys[14], 256)
    p['ln2'] = (s2, b2[None, :] * s2 + sh2)
    # linear3: bias, no BN, no activation.
    p['wl3'] = w(keys[15], 256, output_channels).astype(jnp.bfloat16)
    b3 = 0.01 * jax.random.normal(keys[16], (output_channels,), jnp.float32)
    p['b3'] = b3[None, :]
    return p


# ----------------------------------------------------------------------------
# Full forward pass
# ----------------------------------------------------------------------------
def dgcnn_forward(x, params, k):
    """x: (B, 3, N) point cloud -> (B, output_channels) logits (eval mode)."""
    B, _, N = x.shape
    pts = jnp.transpose(x, (0, 2, 1))                          # (B, N, 3)

    def edge_layer(feat, wt, wd, bn):
        idx = knn_idx(feat, k)
        nbr, ctr = gather_neighbors(feat, idx)
        out = edge_conv_max(nbr, ctr, wt, wd, *bn)             # (B*N, Cout) bf16
        return out.reshape(B, N, -1)

    # Layer 1 works on the raw 3-D points; zero-pad channels 3 -> 8 for layout
    # (zero channels leave knn distances and the conv result unchanged).
    pts_p = jnp.pad(pts, ((0, 0), (0, 0), (0, 5)))
    x1 = edge_layer(pts_p, params['wt1'], params['wd1'], params['bn1'])   # 64
    x2 = edge_layer(x1, params['wt2'], params['wd2'], params['bn2'])      # 64
    x3 = edge_layer(x2, params['wt3'], params['wd3'], params['bn3'])      # 128
    x4 = edge_layer(x3, params['wt4'], params['wd4'], params['bn4'])      # 256

    # No HBM concat: conv5_pool consumes x1..x4 + four weight slices directly.
    pooled = conv5_pool((x1, x2, x3, x4), params['w5_parts'],
                        *params['bn5'])                        # (B, 2, emb)
    h = pooled.reshape(B, -1)                                  # [max | mean]
    return head_mlp(h.astype(jnp.bfloat16), params)            # (B, out)


if __name__ == "__main__":
    # small shapes consistent with the PyTorch module
    K = 4
    EMB_DIMS = 64
    OUTPUT_CHANNELS = 40
    B, N = 2, 16

    key = jax.random.PRNGKey(0)
    kx, kp = jax.random.split(key)
    x = jax.random.normal(kx, (B, 3, N), jnp.float32)          # point cloud (B, 3, N)
    params = init_params(kp, EMB_DIMS, OUTPUT_CHANNELS)

    fwd = jax.jit(functools.partial(dgcnn_forward, k=K))
    out = fwd(x, params)
    out = jax.block_until_ready(out)
    assert out.shape == (B, OUTPUT_CHANNELS)
    assert bool(jnp.all(jnp.isfinite(out)))
    print("KERNEL_OK")
</pallas_src>

<mosaic_0001>
module attributes {stable_mosaic.version = 11 : i64} {
  func.func @_edge_conv_max_kernel(%arg0: i32, %arg1: memref<4x32x8xbf16, #tpu.memory_space<vmem>>, %arg2: memref<32x8xbf16, #tpu.memory_space<vmem>>, %arg3: memref<8x64xbf16, #tpu.memory_space<vmem>>, %arg4: memref<8x64xbf16, #tpu.memory_space<vmem>>, %arg5: memref<1x64xf32, #tpu.memory_space<vmem>>, %arg6: memref<1x64xf32, #tpu.memory_space<vmem>>, %arg7: memref<32x64xbf16, #tpu.memory_space<vmem>>) attributes {dimension_semantics = [#tpu.dimension_semantics<parallel>], iteration_bounds = array<i64: 1>, scalar_prefetch = 0 : i64, scratch_operands = 0 : i64, tpu.core_type = #tpu.core_type<tc>, window_params = [{transform_indices = @transform_0, window_bounds = array<i64: 4, 32, 8>}, {transform_indices = @transform_1, window_bounds = array<i64: 32, 8>}, {pipeline_mode = #tpu.pipeline_mode<synchronous>, transform_indices = @transform_2, window_bounds = array<i64: 8, 64>}, {pipeline_mode = #tpu.pipeline_mode<synchronous>, transform_indices = @transform_3, window_bounds = array<i64: 8, 64>}, {pipeline_mode = #tpu.pipeline_mode<synchronous>, transform_indices = @transform_4, window_bounds = array<i64: 1, 64>}, {pipeline_mode = #tpu.pipeline_mode<synchronous>, transform_indices = @transform_5, window_bounds = array<i64: 1, 64>}, {transform_indices = @transform_6, window_bounds = array<i64: 32, 64>}]} {
    %c0 = arith.constant 0 : index
    %c0_0 = arith.constant 0 : index
    %0 = vector.load %arg3[%c0, %c0_0] : memref<8x64xbf16, #tpu.memory_space<vmem>>, vector<8x64xbf16>
    %c0_1 = arith.constant 0 : index
    %c0_2 = arith.constant 0 : index
    %1 = vector.load %arg2[%c0_1, %c0_2] : memref<32x8xbf16, #tpu.memory_space<vmem>>, vector<32x8xbf16>
    %c0_3 = arith.constant 0 : index
    %c0_4 = arith.constant 0 : index
    %2 = vector.load %arg4[%c0_3, %c0_4] : memref<8x64xbf16, #tpu.memory_space<vmem>>, vector<8x64xbf16>
    %cst = arith.constant dense<0.000000e+00> : vector<32x64xf32>
    %3 = tpu.matmul %1, %2, %cst {dimension_numbers = #tpu.dot_dimension_numbers<[1], [0], [0], [1], [0, 0, 1, 1], [], []>} : vector<32x8xbf16>, vector<8x64xbf16>, vector<32x64xf32> -> vector<32x64xf32>
    %c0_5 = arith.constant 0 : index
    %c0_6 = arith.constant 0 : index
    %c0_7 = arith.constant 0 : index
    %4 = vector.load %arg1[%c0_5, %c0_6, %c0_7] : memref<4x32x8xbf16, #tpu.memory_space<vmem>>, vector<4x32x8xbf16>
    %5 = vector.shape_cast %4 : vector<4x32x8xbf16> to vector<128x8xbf16>
    %cst_8 = arith.constant dense<0.000000e+00> : vector<128x64xf32>
    %6 = tpu.matmul %5, %0, %cst_8 {dimension_numbers = #tpu.dot_dimension_numbers<[1], [0], [0], [1], [0, 0, 1, 1], [], []>} : vector<128x8xbf16>, vector<8x64xbf16>, vector<128x64xf32> -> vector<128x64xf32>
    %7 = vector.shape_cast %6 : vector<128x64xf32> to vector<4x32x64xf32>
    %cst_9 = arith.constant dense<0xFF800000> : vector<32x64xf32>
    %8 = vector.multi_reduction <maximumf>, %7, %cst_9 [0] : vector<4x32x64xf32> to vector<32x64xf32>
    %9 = arith.addf %8, %3 : vector<32x64xf32>
    %c0_10 = arith.constant 0 : index
    %c0_11 = arith.constant 0 : index
    %10 = vector.load %arg5[%c0_10, %c0_11] : memref<1x64xf32, #tpu.memory_space<vmem>>, vector<1x64xf32>
    %11 = vector.broadcast %10 : vector<1x64xf32> to vector<32x64xf32>
    %12 = arith.mulf %9, %11 : vector<32x64xf32>
    %c0_12 = arith.constant 0 : index
    %c0_13 = arith.constant 0 : index
    %13 = vector.load %arg6[%c0_12, %c0_13] : memref<1x64xf32, #tpu.memory_space<vmem>>, vector<1x64xf32>
    %14 = vector.broadcast %13 : vector<1x64xf32> to vector<32x64xf32>
    %15 = arith.addf %12, %14 : vector<32x64xf32>
    %cst_14 = arith.constant 2.000000e-01 : f32
    %16 = vector.broadcast %cst_14 : f32 to vector<32x64xf32>
    %17 = arith.mulf %16, %15 : vector<32x64xf32>
    %18 = arith.maximumf %15, %17 : vector<32x64xf32>
    %19 = arith.truncf %18 : vector<32x64xf32> to vector<32x64xbf16>
    %c0_15 = arith.constant 0 : index
    %c0_16 = arith.constant 0 : index
    %20 = vector.load %arg7[%c0_15, %c0_16] : memref<32x64xbf16, #tpu.memory_space<vmem>>, vector<32x64xbf16>
    tpu.vector_store %arg7[%c0_15, %c0_16], %19 {strides = array<i32>} : memref<32x64xbf16, #tpu.memory_space<vmem>>, vector<32x64xbf16>,
    return
  }
  func.func @transform_0(%arg0: i32) -> (i32, i32, i32) {
    %c0_i32 = arith.constant 0 : i32
    %c0_i32_0 = arith.constant 0 : i32
    %c0_i32_1 = arith.constant 0 : i32
    return %c0_i32, %arg0, %c0_i32_0 : i32, i32, i32
  }
  func.func @transform_1(%arg0: i32) -> (i32, i32) {
    %c0_i32 = arith.constant 0 : i32
    %c0_i32_0 = arith.constant 0 : i32
    return %arg0, %c0_i32 : i32, i32
  }
  func.func @transform_2(%arg0: i32) -> (i32, i32) {
    %c0_i32 = arith.constant 0 : i32
    %c0_i32_0 = arith.constant 0 : i32
    %c0_i32_1 = arith.constant 0 : i32
    return %c0_i32, %c0_i32_0 : i32, i32
  }
  func.func @transform_3(%arg0: i32) -> (i32, i32) {
    %c0_i32 = arith.constant 0 : i32
    %c0_i32_0 = arith.constant 0 : i32
    %c0_i32_1 = arith.constant 0 : i32
    return %c0_i32, %c0_i32_0 : i32, i32
  }
  func.func @transform_4(%arg0: i32) -> (i32, i32) {
    %c0_i32 = arith.constant 0 : i32
    %c0_i32_0 = arith.constant 0 : i32
    %c0_i32_1 = arith.constant 0 : i32
    return %c0_i32, %c0_i32_0 : i32, i32
  }
  func.func @transform_5(%arg0: i32) -> (i32, i32) {
    %c0_i32 = arith.constant 0 : i32
    %c0_i32_0 = arith.constant 0 : i32
    %c0_i32_1 = arith.constant 0 : i32
    return %c0_i32, %c0_i32_0 : i32, i32
  }
  func.func @transform_6(%arg0: i32) -> (i32, i32) {
    %c0_i32 = arith.constant 0 : i32
    %c0_i32_0 = arith.constant 0 : i32
    return %arg0, %c0_i32 : i32, i32
  }
}

module attributes {stable_mosaic.version = 11 : i64} {
  func.func @_edge_conv_max_kernel(%arg0: i32, %arg1: memref<4x32x64xbf16, #tpu.memory_space<vmem>>, %arg2: memref<32x64xbf16, #tpu.memory_space<vmem>>, %arg3: memref<64x64xbf16, #tpu.memory_space<vmem>>, %arg4: memref<64x64xbf16, #tpu.memory_space<vmem>>, %arg5: memref<1x64xf32, #tpu.memory_space<vmem>>, %arg6: memref<1x64xf32, #tpu.memory_space<vmem>>, %arg7: memref<32x64xbf16, #tpu.memory_space<vmem>>) attributes {dimension_semantics = [#tpu.dimension_semantics<parallel>], iteration_bounds = array<i64: 1>, scalar_prefetch = 0 : i64, scratch_operands = 0 : i64, tpu.core_type = #tpu.core_type<tc>, window_params = [{transform_indices = @transform_0, window_bounds = array<i64: 4, 32, 64>}, {transform_indices = @transform_1, window_bounds = array<i64: 32, 64>}, {pipeline_mode = #tpu.pipeline_mode<synchronous>, transform_indices = @transform_2, window_bounds = array<i64: 64, 64>}, {pipeline_mode = #tpu.pipeline_mode<synchronous>, transform_indices = @transform_3, window_bounds = array<i64: 64, 64>}, {pipeline_mode = #tpu.pipeline_mode<synchronous>, transform_indices = @transform_4, window_bounds = array<i64: 1, 64>}, {pipeline_mode = #tpu.pipeline_mode<synchronous>, transform_indices = @transform_5, window_bounds = array<i64: 1, 64>}, {transform_indices = @transform_6, window_bounds = array<i64: 32, 64>}]} {
    %c0 = arith.constant 0 : index
    %c0_0 = arith.constant 0 : index
    %0 = vector.load %arg3[%c0, %c0_0] : memref<64x64xbf16, #tpu.memory_space<vmem>>, vector<64x64xbf16>
    %c0_1 = arith.constant 0 : index
    %c0_2 = arith.constant 0 : index
    %1 = vector.load %arg2[%c0_1, %c0_2] : memref<32x64xbf16, #tpu.memory_space<vmem>>, vector<32x64xbf16>
    %c0_3 = arith.constant 0 : index
    %c0_4 = arith.constant 0 : index
    %2 = vector.load %arg4[%c0_3, %c0_4] : memref<64x64xbf16, #tpu.memory_space<vmem>>, vector<64x64xbf16>
    %cst = arith.constant dense<0.000000e+00> : vector<32x64xf32>
    %3 = tpu.matmul %1, %2, %cst {dimension_numbers = #tpu.dot_dimension_numbers<[1], [0], [0], [1], [0, 0, 1, 1], [], []>} : vector<32x64xbf16>, vector<64x64xbf16>, vector<32x64xf32> -> vector<32x64xf32>
    %c0_5 = arith.constant 0 : index
    %c0_6 = arith.constant 0 : index
    %c0_7 = arith.constant 0 : index
    %4 = vector.load %arg1[%c0_5, %c0_6, %c0_7] : memref<4x32x64xbf16, #tpu.memory_space<vmem>>, vector<4x32x64xbf16>
    %5 = vector.shape_cast %4 : vector<4x32x64xbf16> to vector<128x64xbf16>
    %cst_8 = arith.constant dense<0.000000e+00> : vector<128x64xf32>
    %6 = tpu.matmul %5, %0, %cst_8 {dimension_numbers = #tpu.dot_dimension_numbers<[1], [0], [0], [1], [0, 0, 1, 1], [], []>} : vector<128x64xbf16>, vector<64x64xbf16>, vector<128x64xf32> -> vector<128x64xf32>
    %7 = vector.shape_cast %6 : vector<128x64xf32> to vector<4x32x64xf32>
    %cst_9 = arith.constant dense<0xFF800000> : vector<32x64xf32>
    %8 = vector.multi_reduction <maximumf>, %7, %cst_9 [0] : vector<4x32x64xf32> to vector<32x64xf32>
    %9 = arith.addf %8, %3 : vector<32x64xf32>
    %c0_10 = arith.constant 0 : index
    %c0_11 = arith.constant 0 : index
    %10 = vector.load %arg5[%c0_10, %c0_11] : memref<1x64xf32, #tpu.memory_space<vmem>>, vector<1x64xf32>
    %11 = vector.broadcast %10 : vector<1x64xf32> to vector<32x64xf32>
    %12 = arith.mulf %9, %11 : vector<32x64xf32>
    %c0_12 = arith.constant 0 : index
    %c0_13 = arith.constant 0 : index
    %13 = vector.load %arg6[%c0_12, %c0_13] : memref<1x64xf32, #tpu.memory_space<vmem>>, vector<1x64xf32>
    %14 = vector.broadcast %13 : vector<1x64xf32> to vector<32x64xf32>
    %15 = arith.addf %12, %14 : vector<32x64xf32>
    %cst_14 = arith.constant 2.000000e-01 : f32
    %16 = vector.broadcast %cst_14 : f32 to vector<32x64xf32>
    %17 = arith.mulf %16, %15 : vector<32x64xf32>
    %18 = arith.maximumf %15, %17 : vector<32x64xf32>
    %19 = arith.truncf %18 : vector<32x64xf32> to vector<32x64xbf16>
    %c0_15 = arith.constant 0 : index
    %c0_16 = arith.constant 0 : index
    %20 = vector.load %arg7[%c0_15, %c0_16] : memref<32x64xbf16, #tpu.memory_space<vmem>>, vector<32x64xbf16>
    tpu.vector_store %arg7[%c0_15, %c0_16], %19 {strides = array<i32>} : memref<32x64xbf16, #tpu.memory_space<vmem>>, vector<32x64xbf16>,
    return
  }
  func.func @transform_0(%arg0: i32) -> (i32, i32, i32) {
    %c0_i32 = arith.constant 0 : i32
    %c0_i32_0 = arith.constant 0 : i32
    %c0_i32_1 = arith.constant 0 : i32
    return %c0_i32, %arg0, %c0_i32_0 : i32, i32, i32
  }
  func.func @transform_1(%arg0: i32) -> (i32, i32) {
    %c0_i32 = arith.constant 0 : i32
    %c0_i32_0 = arith.constant 0 : i32
    return %arg0, %c0_i32 : i32, i32
  }
  func.func @transform_2(%arg0: i32) -> (i32, i32) {
    %c0_i32 = arith.constant 0 : i32
    %c0_i32_0 = arith.constant 0 : i32
    %c0_i32_1 = arith.constant 0 : i32
    return %c0_i32, %c0_i32_0 : i32, i32
  }
  func.func @transform_3(%arg0: i32) -> (i32, i32) {
    %c0_i32 = arith.constant 0 : i32
    %c0_i32_0 = arith.constant 0 : i32
    %c0_i32_1 = arith.constant 0 : i32
    return %c0_i32, %c0_i32_0 : i32, i32
  }
  func.func @transform_4(%arg0: i32) -> (i32, i32) {
    %c0_i32 = arith.constant 0 : i32
    %c0_i32_0 = arith.constant 0 : i32
    %c0_i32_1 = arith.constant 0 : i32
    return %c0_i32, %c0_i32_0 : i32, i32
  }
  func.func @transform_5(%arg0: i32) -> (i32, i32) {
    %c0_i32 = arith.constant 0 : i32
    %c0_i32_0 = arith.constant 0 : i32
    %c0_i32_1 = arith.constant 0 : i32
    return %c0_i32, %c0_i32_0 : i32, i32
  }
  func.func @transform_6(%arg0: i32) -> (i32, i32) {
    %c0_i32 = arith.constant 0 : i32
    %c0_i32_0 = arith.constant 0 : i32
    return %arg0, %c0_i32 : i32, i32
  }
}

module attributes {stable_mosaic.version = 11 : i64} {
  func.func @_edge_conv_max_kernel(%arg0: i32, %arg1: memref<4x32x64xbf16, #tpu.memory_space<vmem>>, %arg2: memref<32x64xbf16, #tpu.memory_space<vmem>>, %arg3: memref<64x128xbf16, #tpu.memory_space<vmem>>, %arg4: memref<64x128xbf16, #tpu.memory_space<vmem>>, %arg5: memref<1x128xf32, #tpu.memory_space<vmem>>, %arg6: memref<1x128xf32, #tpu.memory_space<vmem>>, %arg7: memref<32x128xbf16, #tpu.memory_space<vmem>>) attributes {dimension_semantics = [#tpu.dimension_semantics<parallel>], iteration_bounds = array<i64: 1>, scalar_prefetch = 0 : i64, scratch_operands = 0 : i64, tpu.core_type = #tpu.core_type<tc>, window_params = [{transform_indices = @transform_0, window_bounds = array<i64: 4, 32, 64>}, {transform_indices = @transform_1, window_bounds = array<i64: 32, 64>}, {pipeline_mode = #tpu.pipeline_mode<synchronous>, transform_indices = @transform_2, window_bounds = array<i64: 64, 128>}, {pipeline_mode = #tpu.pipeline_mode<synchronous>, transform_indices = @transform_3, window_bounds = array<i64: 64, 128>}, {pipeline_mode = #tpu.pipeline_mode<synchronous>, transform_indices = @transform_4, window_bounds = array<i64: 1, 128>}, {pipeline_mode = #tpu.pipeline_mode<synchronous>, transform_indices = @transform_5, window_bounds = array<i64: 1, 128>}, {transform_indices = @transform_6, window_bounds = array<i64: 32, 128>}]} {
    %c0 = arith.constant 0 : index
    %c0_0 = arith.constant 0 : index
    %0 = vector.load %arg3[%c0, %c0_0] : memref<64x128xbf16, #tpu.memory_space<vmem>>, vector<64x128xbf16>
    %c0_1 = arith.constant 0 : index
    %c0_2 = arith.constant 0 : index
    %1 = vector.load %arg2[%c0_1, %c0_2] : memref<32x64xbf16, #tpu.memory_space<vmem>>, vector<32x64xbf16>
    %c0_3 = arith.constant 0 : index
    %c0_4 = arith.constant 0 : index
    %2 = vector.load %arg4[%c0_3, %c0_4] : memref<64x128xbf16, #tpu.memory_space<vmem>>, vector<64x128xbf16>
    %cst = arith.constant dense<0.000000e+00> : vector<32x128xf32>
    %3 = tpu.matmul %1, %2, %cst {dimension_numbers = #tpu.dot_dimension_numbers<[1], [0], [0], [1], [0, 0, 1, 1], [], []>} : vector<32x64xbf16>, vector<64x128xbf16>, vector<32x128xf32> -> vector<32x128xf32>
    %c0_5 = arith.constant 0 : index
    %c0_6 = arith.constant 0 : index
    %c0_7 = arith.constant 0 : index
    %4 = vector.load %arg1[%c0_5, %c0_6, %c0_7] : memref<4x32x64xbf16, #tpu.memory_space<vmem>>, vector<4x32x64xbf16>
    %5 = vector.shape_cast %4 : vector<4x32x64xbf16> to vector<128x64xbf16>
    %cst_8 = arith.constant dense<0.000000e+00> : vector<128x128xf32>
    %6 = tpu.matmul %5, %0, %cst_8 {dimension_numbers = #tpu.dot_dimension_numbers<[1], [0], [0], [1], [0, 0, 1, 1], [], []>} : vector<128x64xbf16>, vector<64x128xbf16>, vector<128x128xf32> -> vector<128x128xf32>
    %7 = vector.shape_cast %6 : vector<128x128xf32> to vector<4x32x128xf32>
    %cst_9 = arith.constant dense<0xFF800000> : vector<32x128xf32>
    %8 = vector.multi_reduction <maximumf>, %7, %cst_9 [0] : vector<4x32x128xf32> to vector<32x128xf32>
    %9 = arith.addf %8, %3 : vector<32x128xf32>
    %c0_10 = arith.constant 0 : index
    %c0_11 = arith.constant 0 : index
    %10 = vector.load %arg5[%c0_10, %c0_11] : memref<1x128xf32, #tpu.memory_space<vmem>>, vector<1x128xf32>
    %11 = vector.broadcast %10 : vector<1x128xf32> to vector<32x128xf32>
    %12 = arith.mulf %9, %11 : vector<32x128xf32>
    %c0_12 = arith.constant 0 : index
    %c0_13 = arith.constant 0 : index
    %13 = vector.load %arg6[%c0_12, %c0_13] : memref<1x128xf32, #tpu.memory_space<vmem>>, vector<1x128xf32>
    %14 = vector.broadcast %13 : vector<1x128xf32> to vector<32x128xf32>
    %15 = arith.addf %12, %14 : vector<32x128xf32>
    %cst_14 = arith.constant 2.000000e-01 : f32
    %16 = vector.broadcast %cst_14 : f32 to vector<32x128xf32>
    %17 = arith.mulf %16, %15 : vector<32x128xf32>
    %18 = arith.maximumf %15, %17 : vector<32x128xf32>
    %19 = arith.truncf %18 : vector<32x128xf32> to vector<32x128xbf16>
    %c0_15 = arith.constant 0 : index
    %c0_16 = arith.constant 0 : index
    %20 = vector.load %arg7[%c0_15, %c0_16] : memref<32x128xbf16, #tpu.memory_space<vmem>>, vector<32x128xbf16>
    tpu.vector_store %arg7[%c0_15, %c0_16], %19 {strides = array<i32>} : memref<32x128xbf16, #tpu.memory_space<vmem>>, vector<32x128xbf16>,
    return
  }
  func.func @transform_0(%arg0: i32) -> (i32, i32, i32) {
    %c0_i32 = arith.constant 0 : i32
    %c0_i32_0 = arith.constant 0 : i32
    %c0_i32_1 = arith.constant 0 : i32
    return %c0_i32, %arg0, %c0_i32_0 : i32, i32, i32
  }
  func.func @transform_1(%arg0: i32) -> (i32, i32) {
    %c0_i32 = arith.constant 0 : i32
    %c0_i32_0 = arith.constant 0 : i32
    return %arg0, %c0_i32 : i32, i32
  }
  func.func @transform_2(%arg0: i32) -> (i32, i32) {
    %c0_i32 = arith.constant 0 : i32
    %c0_i32_0 = arith.constant 0 : i32
    %c0_i32_1 = arith.constant 0 : i32
    return %c0_i32, %c0_i32_0 : i32, i32
  }
  func.func @transform_3(%arg0: i32) -> (i32, i32) {
    %c0_i32 = arith.constant 0 : i32
    %c0_i32_0 = arith.constant 0 : i32
    %c0_i32_1 = arith.constant 0 : i32
    return %c0_i32, %c0_i32_0 : i32, i32
  }
  func.func @transform_4(%arg0: i32) -> (i32, i32) {
    %c0_i32 = arith.constant 0 : i32
    %c0_i32_0 = arith.constant 0 : i32
    %c0_i32_1 = arith.constant 0 : i32
    return %c0_i32, %c0_i32_0 : i32, i32
  }
  func.func @transform_5(%arg0: i32) -> (i32, i32) {
    %c0_i32 = arith.constant 0 : i32
    %c0_i32_0 = arith.constant 0 : i32
    %c0_i32_1 = arith.constant 0 : i32
    return %c0_i32, %c0_i32_0 : i32, i32
  }
  func.func @transform_6(%arg0: i32) -> (i32, i32) {
    %c0_i32 = arith.constant 0 : i32
    %c0_i32_0 = arith.constant 0 : i32
    return %arg0, %c0_i32 : i32, i32
  }
}

module attributes {stable_mosaic.version = 11 : i64} {
  func.func @_edge_conv_max_kernel(%arg0: i32, %arg1: memref<4x32x128xbf16, #tpu.memory_space<vmem>>, %arg2: memref<32x128xbf16, #tpu.memory_space<vmem>>, %arg3: memref<128x256xbf16, #tpu.memory_space<vmem>>, %arg4: memref<128x256xbf16, #tpu.memory_space<vmem>>, %arg5: memref<1x256xf32, #tpu.memory_space<vmem>>, %arg6: memref<1x256xf32, #tpu.memory_space<vmem>>, %arg7: memref<32x256xbf16, #tpu.memory_space<vmem>>) attributes {dimension_semantics = [#tpu.dimension_semantics<parallel>], iteration_bounds = array<i64: 1>, scalar_prefetch = 0 : i64, scratch_operands = 0 : i64, tpu.core_type = #tpu.core_type<tc>, window_params = [{transform_indices = @transform_0, window_bounds = array<i64: 4, 32, 128>}, {transform_indices = @transform_1, window_bounds = array<i64: 32, 128>}, {pipeline_mode = #tpu.pipeline_mode<synchronous>, transform_indices = @transform_2, window_bounds = array<i64: 128, 256>}, {pipeline_mode = #tpu.pipeline_mode<synchronous>, transform_indices = @transform_3, window_bounds = array<i64: 128, 256>}, {pipeline_mode = #tpu.pipeline_mode<synchronous>, transform_indices = @transform_4, window_bounds = array<i64: 1, 256>}, {pipeline_mode = #tpu.pipeline_mode<synchronous>, transform_indices = @transform_5, window_bounds = array<i64: 1, 256>}, {transform_indices = @transform_6, window_bounds = array<i64: 32, 256>}]} {
    %c0 = arith.constant 0 : index
    %c0_0 = arith.constant 0 : index
    %0 = vector.load %arg3[%c0, %c0_0] : memref<128x256xbf16, #tpu.memory_space<vmem>>, vector<128x256xbf16>
    %c0_1 = arith.constant 0 : index
    %c0_2 = arith.constant 0 : index
    %1 = vector.load %arg2[%c0_1, %c0_2] : memref<32x128xbf16, #tpu.memory_space<vmem>>, vector<32x128xbf16>
    %c0_3 = arith.constant 0 : index
    %c0_4 = arith.constant 0 : index
    %2 = vector.load %arg4[%c0_3, %c0_4] : memref<128x256xbf16, #tpu.memory_space<vmem>>, vector<128x256xbf16>
    %cst = arith.constant dense<0.000000e+00> : vector<32x256xf32>
    %3 = tpu.matmul %1, %2, %cst {dimension_numbers = #tpu.dot_dimension_numbers<[1], [0], [0], [1], [0, 0, 1, 1], [], []>} : vector<32x128xbf16>, vector<128x256xbf16>, vector<32x256xf32> -> vector<32x256xf32>
    %c0_5 = arith.constant 0 : index
    %c0_6 = arith.constant 0 : index
    %c0_7 = arith.constant 0 : index
    %4 = vector.load %arg1[%c0_5, %c0_6, %c0_7] : memref<4x32x128xbf16, #tpu.memory_space<vmem>>, vector<4x32x128xbf16>
    %5 = vector.shape_cast %4 : vector<4x32x128xbf16> to vector<128x128xbf16>
    %cst_8 = arith.constant dense<0.000000e+00> : vector<128x256xf32>
    %6 = tpu.matmul %5, %0, %cst_8 {dimension_numbers = #tpu.dot_dimension_numbers<[1], [0], [0], [1], [0, 0, 1, 1], [], []>} : vector<128x128xbf16>, vector<128x256xbf16>, vector<128x256xf32> -> vector<128x256xf32>
    %7 = vector.shape_cast %6 : vector<128x256xf32> to vector<4x32x256xf32>
    %cst_9 = arith.constant dense<0xFF800000> : vector<32x256xf32>
    %8 = vector.multi_reduction <maximumf>, %7, %cst_9 [0] : vector<4x32x256xf32> to vector<32x256xf32>
    %9 = arith.addf %8, %3 : vector<32x256xf32>
    %c0_10 = arith.constant 0 : index
    %c0_11 = arith.constant 0 : index
    %10 = vector.load %arg5[%c0_10, %c0_11] : memref<1x256xf32, #tpu.memory_space<vmem>>, vector<1x256xf32>
    %11 = vector.broadcast %10 : vector<1x256xf32> to vector<32x256xf32>
    %12 = arith.mulf %9, %11 : vector<32x256xf32>
    %c0_12 = arith.constant 0 : index
    %c0_13 = arith.constant 0 : index
    %13 = vector.load %arg6[%c0_12, %c0_13] : memref<1x256xf32, #tpu.memory_space<vmem>>, vector<1x256xf32>
    %14 = vector.broadcast %13 : vector<1x256xf32> to vector<32x256xf32>
    %15 = arith.addf %12, %14 : vector<32x256xf32>
    %cst_14 = arith.constant 2.000000e-01 : f32
    %16 = vector.broadcast %cst_14 : f32 to vector<32x256xf32>
    %17 = arith.mulf %16, %15 : vector<32x256xf32>
    %18 = arith.maximumf %15, %17 : vector<32x256xf32>
    %19 = arith.truncf %18 : vector<32x256xf32> to vector<32x256xbf16>
    %c0_15 = arith.constant 0 : index
    %c0_16 = arith.constant 0 : index
    %20 = vector.load %arg7[%c0_15, %c0_16] : memref<32x256xbf16, #tpu.memory_space<vmem>>, vector<32x256xbf16>
    tpu.vector_store %arg7[%c0_15, %c0_16], %19 {strides = array<i32>} : memref<32x256xbf16, #tpu.memory_space<vmem>>, vector<32x256xbf16>,
    return
  }
  func.func @transform_0(%arg0: i32) -> (i32, i32, i32) {
    %c0_i32 = arith.constant 0 : i32
    %c0_i32_0 = arith.constant 0 : i32
    %c0_i32_1 = arith.constant 0 : i32
    return %c0_i32, %arg0, %c0_i32_0 : i32, i32, i32
  }
  func.func @transform_1(%arg0: i32) -> (i32, i32) {
    %c0_i32 = arith.constant 0 : i32
    %c0_i32_0 = arith.constant 0 : i32
    return %arg0, %c0_i32 : i32, i32
  }
  func.func @transform_2(%arg0: i32) -> (i32, i32) {
    %c0_i32 = arith.constant 0 : i32
    %c0_i32_0 = arith.constant 0 : i32
    %c0_i32_1 = arith.constant 0 : i32
    return %c0_i32, %c0_i32_0 : i32, i32
  }
  func.func @transform_3(%arg0: i32) -> (i32, i32) {
    %c0_i32 = arith.constant 0 : i32
    %c0_i32_0 = arith.constant 0 : i32
    %c0_i32_1 = arith.constant 0 : i32
    return %c0_i32, %c0_i32_0 : i32, i32
  }
  func.func @transform_4(%arg0: i32) -> (i32, i32) {
    %c0_i32 = arith.constant 0 : i32
    %c0_i32_0 = arith.constant 0 : i32
    %c0_i32_1 = arith.constant 0 : i32
    return %c0_i32, %c0_i32_0 : i32, i32
  }
  func.func @transform_5(%arg0: i32) -> (i32, i32) {
    %c0_i32 = arith.constant 0 : i32
    %c0_i32_0 = arith.constant 0 : i32
    %c0_i32_1 = arith.constant 0 : i32
    return %c0_i32, %c0_i32_0 : i32, i32
  }
  func.func @transform_6(%arg0: i32) -> (i32, i32) {
    %c0_i32 = arith.constant 0 : i32
    %c0_i32_0 = arith.constant 0 : i32
    return %arg0, %c0_i32 : i32, i32
  }
}

module attributes {stable_mosaic.version = 11 : i64} {
  func.func @_conv5_pool_kernel(%arg0: i32, %arg1: i32, %arg2: memref<1x16x64xbf16, #tpu.memory_space<vmem>>, %arg3: memref<1x16x64xbf16, #tpu.memory_space<vmem>>, %arg4: memref<1x16x128xbf16, #tpu.memory_space<vmem>>, %arg5: memref<1x16x256xbf16, #tpu.memory_space<vmem>>, %arg6: memref<64x64xbf16, #tpu.memory_space<vmem>>, %arg7: memref<64x64xbf16, #tpu.memory_space<vmem>>, %arg8: memref<128x64xbf16, #tpu.memory_space<vmem>>, %arg9: memref<256x64xbf16, #tpu.memory_space<vmem>>, %arg10: memref<1x64xf32, #tpu.memory_space<vmem>>, %arg11: memref<1x64xf32, #tpu.memory_space<vmem>>, %arg12: memref<1x2x64xf32, #tpu.memory_space<vmem>>, %arg13: memref<1x64xf32, #tpu.memory_space<vmem>>, %arg14: memref<1x64xf32, #tpu.memory_space<vmem>>) attributes {dimension_semantics = [#tpu.dimension_semantics<parallel>, #tpu.dimension_semantics<arbitrary>], iteration_bounds = array<i64: 2, 1>, scalar_prefetch = 0 : i64, scratch_operands = 2 : i64, tpu.core_type = #tpu.core_type<tc>, window_params = [{transform_indices = @transform_0, window_bounds = array<i64: 1, 16, 64>}, {transform_indices = @transform_1, window_bounds = array<i64: 1, 16, 64>}, {transform_indices = @transform_2, window_bounds = array<i64: 1, 16, 128>}, {transform_indices = @transform_3, window_bounds = array<i64: 1, 16, 256>}, {pipeline_mode = #tpu.pipeline_mode<synchronous>, transform_indices = @transform_4, window_bounds = array<i64: 64, 64>}, {pipeline_mode = #tpu.pipeline_mode<synchronous>, transform_indices = @transform_5, window_bounds = array<i64: 64, 64>}, {pipeline_mode = #tpu.pipeline_mode<synchronous>, transform_indices = @transform_6, window_bounds = array<i64: 128, 64>}, {pipeline_mode = #tpu.pipeline_mode<synchronous>, transform_indices = @transform_7, window_bounds = array<i64: 256, 64>}, {pipeline_mode = #tpu.pipeline_mode<synchronous>, transform_indices = @transform_8, window_bounds = array<i64: 1, 64>}, {pipeline_mode = #tpu.pipeline_mode<synchronous>, transform_indices = @transform_9, window_bounds = array<i64: 1, 64>}, {transform_indices = @transform_10, window_bounds = array<i64: 1, 2, 64>}]} {
    %c0_i32 = arith.constant 0 : i32
    %0 = arith.cmpi eq, %arg1, %c0_i32 : i32
    %1 = arith.extui %0 : i1 to i32
    %c0_i32_0 = arith.constant 0 : i32
    %2 = arith.cmpi ne, %1, %c0_i32_0 : i32
    scf.if %2 {
      %cst_40 = arith.constant 0xFF800000 : f32
      %44 = vector.broadcast %cst_40 : f32 to vector<1x64xf32>
      %c0_41 = arith.constant 0 : index
      %c0_42 = arith.constant 0 : index
      %45 = vector.load %arg13[%c0_41, %c0_42] : memref<1x64xf32, #tpu.memory_space<vmem>>, vector<1x64xf32>
      tpu.vector_store %arg13[%c0_41, %c0_42], %44 {strides = array<i32>} : memref<1x64xf32, #tpu.memory_space<vmem>>, vector<1x64xf32>,
      %cst_43 = arith.constant 0.000000e+00 : f32
      %46 = vector.broadcast %cst_43 : f32 to vector<1x64xf32>
      %c0_44 = arith.constant 0 : index
      %c0_45 = arith.constant 0 : index
      %47 = vector.load %arg14[%c0_44, %c0_45] : memref<1x64xf32, #tpu.memory_space<vmem>>, vector<1x64xf32>
      tpu.vector_store %arg14[%c0_44, %c0_45], %46 {strides = array<i32>} : memref<1x64xf32, #tpu.memory_space<vmem>>, vector<1x64xf32>,
    } else {
    }
    %c0 = arith.constant 0 : index
    %c0_1 = arith.constant 0 : index
    %c0_2 = arith.constant 0 : index
    %3 = vector.load %arg2[%c0, %c0_1, %c0_2] : memref<1x16x64xbf16, #tpu.memory_space<vmem>>, vector<1x16x64xbf16>
    %4 = vector.shape_cast %3 : vector<1x16x64xbf16> to vector<16x64xbf16>
    %c0_3 = arith.constant 0 : index
    %c0_4 = arith.constant 0 : index
    %5 = vector.load %arg6[%c0_3, %c0_4] : memref<64x64xbf16, #tpu.memory_space<vmem>>, vector<64x64xbf16>
    %cst = arith.constant dense<0.000000e+00> : vector<16x64xf32>
    %6 = tpu.matmul %4, %5, %cst {dimension_numbers = #tpu.dot_dimension_numbers<[1], [0], [0], [1], [0, 0, 1, 1], [], []>} : vector<16x64xbf16>, vector<64x64xbf16>, vector<16x64xf32> -> vector<16x64xf32>
    %c0_5 = arith.constant 0 : index
    %c0_6 = arith.constant 0 : index
    %c0_7 = arith.constant 0 : index
    %7 = vector.load %arg3[%c0_5, %c0_6, %c0_7] : memref<1x16x64xbf16, #tpu.memory_space<vmem>>, vector<1x16x64xbf16>
    %8 = vector.shape_cast %7 : vector<1x16x64xbf16> to vector<16x64xbf16>
    %c0_8 = arith.constant 0 : index
    %c0_9 = arith.constant 0 : index
    %9 = vector.load %arg7[%c0_8, %c0_9] : memref<64x64xbf16, #tpu.memory_space<vmem>>, vector<64x64xbf16>
    %cst_10 = arith.constant dense<0.000000e+00> : vector<16x64xf32>
    %10 = tpu.matmul %8, %9, %cst_10 {dimension_numbers = #tpu.dot_dimension_numbers<[1], [0], [0], [1], [0, 0, 1, 1], [], []>} : vector<16x64xbf16>, vector<64x64xbf16>, vector<16x64xf32> -> vector<16x64xf32>
    %11 = arith.addf %6, %10 : vector<16x64xf32>
    %c0_11 = arith.constant 0 : index
    %c0_12 = arith.constant 0 : index
    %c0_13 = arith.constant 0 : index
    %12 = vector.load %arg4[%c0_11, %c0_12, %c0_13] : memref<1x16x128xbf16, #tpu.memory_space<vmem>>, vector<1x16x128xbf16>
    %13 = vector.shape_cast %12 : vector<1x16x128xbf16> to vector<16x128xbf16>
    %c0_14 = arith.constant 0 : index
    %c0_15 = arith.constant 0 : index
    %14 = vector.load %arg8[%c0_14, %c0_15] : memref<128x64xbf16, #tpu.memory_space<vmem>>, vector<128x64xbf16>
    %cst_16 = arith.constant dense<0.000000e+00> : vector<16x64xf32>
    %15 = tpu.matmul %13, %14, %cst_16 {dimension_numbers = #tpu.dot_dimension_numbers<[1], [0], [0], [1], [0, 0, 1, 1], [], []>} : vector<16x128xbf16>, vector<128x64xbf16>, vector<16x64xf32> -> vector<16x64xf32>
    %16 = arith.addf %11, %15 : vector<16x64xf32>
    %c0_17 = arith.constant 0 : index
    %c0_18 = arith.constant 0 : index
    %c0_19 = arith.constant 0 : index
    %17 = vector.load %arg5[%c0_17, %c0_18, %c0_19] : memref<1x16x256xbf16, #tpu.memory_space<vmem>>, vector<1x16x256xbf16>
    %18 = vector.shape_cast %17 : vector<1x16x256xbf16> to vector<16x256xbf16>
    %c0_20 = arith.constant 0 : index
    %c0_21 = arith.constant 0 : index
    %19 = vector.load %arg9[%c0_20, %c0_21] : memref<256x64xbf16, #tpu.memory_space<vmem>>, vector<256x64xbf16>
    %cst_22 = arith.constant dense<0.000000e+00> : vector<16x64xf32>
    %20 = tpu.matmul %18, %19, %cst_22 {dimension_numbers = #tpu.dot_dimension_numbers<[1], [0], [0], [1], [0, 0, 1, 1], [], []>} : vector<16x256xbf16>, vector<256x64xbf16>, vector<16x64xf32> -> vector<16x64xf32>
    %21 = arith.addf %16, %20 : vector<16x64xf32>
    %c0_23 = arith.constant 0 : index
    %c0_24 = arith.constant 0 : index
    %22 = vector.load %arg10[%c0_23, %c0_24] : memref<1x64xf32, #tpu.memory_space<vmem>>, vector<1x64xf32>
    %23 = vector.broadcast %22 : vector<1x64xf32> to vector<16x64xf32>
    %24 = arith.mulf %21, %23 : vector<16x64xf32>
    %c0_25 = arith.constant 0 : index
    %c0_26 = arith.constant 0 : index
    %25 = vector.load %arg11[%c0_25, %c0_26] : memref<1x64xf32, #tpu.memory_space<vmem>>, vector<1x64xf32>
    %26 = vector.broadcast %25 : vector<1x64xf32> to vector<16x64xf32>
    %27 = arith.addf %24, %26 : vector<16x64xf32>
    %cst_27 = arith.constant 2.000000e-01 : f32
    %28 = vector.broadcast %cst_27 : f32 to vector<16x64xf32>
    %29 = arith.mulf %28, %27 : vector<16x64xf32>
    %30 = arith.maximumf %27, %29 : vector<16x64xf32>
    %c0_28 = arith.constant 0 : index
    %c0_29 = arith.constant 0 : index
    %31 = vector.load %arg13[%c0_28, %c0_29] : memref<1x64xf32, #tpu.memory_space<vmem>>, vector<1x64xf32>
    %cst_30 = arith.constant dense<0xFF800000> : vector<64xf32>
    %32 = vector.multi_reduction <maximumf>, %30, %cst_30 [0] : vector<16x64xf32> to vector<64xf32>
    %33 = vector.shape_cast %32 : vector<64xf32> to vector<1x64xf32>
    %34 = arith.maximumf %31, %33 : vector<1x64xf32>
    %c0_31 = arith.constant 0 : index
    %c0_32 = arith.constant 0 : index
    %35 = vector.load %arg13[%c0_31, %c0_32] : memref<1x64xf32, #tpu.memory_space<vmem>>, vector<1x64xf32>
    tpu.vector_store %arg13[%c0_31, %c0_32], %34 {strides = array<i32>} : memref<1x64xf32, #tpu.memory_space<vmem>>, vector<1x64xf32>,
    %c0_33 = arith.constant 0 : index
    %c0_34 = arith.constant 0 : index
    %36 = vector.load %arg14[%c0_33, %c0_34] : memref<1x64xf32, #tpu.memory_space<vmem>>, vector<1x64xf32>
    %cst_35 = arith.constant dense<0.000000e+00> : vector<64xf32>
    %37 = vector.multi_reduction <add>, %30, %cst_35 [0] : vector<16x64xf32> to vector<64xf32>
    %38 = vector.shape_cast %37 : vector<64xf32> to vector<1x64xf32>
    %39 = arith.addf %36, %38 : vector<1x64xf32>
    %c0_36 = arith.constant 0 : index
    %c0_37 = arith.constant 0 : index
    %40 = vector.load %arg14[%c0_36, %c0_37] : memref<1x64xf32, #tpu.memory_space<vmem>>, vector<1x64xf32>
    tpu.vector_store %arg14[%c0_36, %c0_37], %39 {strides = array<i32>} : memref<1x64xf32, #tpu.memory_space<vmem>>, vector<1x64xf32>,
    %c0_i32_38 = arith.constant 0 : i32
    %41 = arith.cmpi eq, %arg1, %c0_i32_38 : i32
    %42 = arith.extui %41 : i1 to i32
    %c0_i32_39 = arith.constant 0 : i32
    %43 = arith.cmpi ne, %42, %c0_i32_39 : i32
    scf.if %43 {
      %c0_40 = arith.constant 0 : index
      %c0_41 = arith.constant 0 : index
      %44 = vector.load %arg13[%c0_40, %c0_41] : memref<1x64xf32, #tpu.memory_space<vmem>>, vector<1x64xf32>
      %c0_42 = arith.constant 0 : index
      %c0_43 = arith.constant 0 : index
      %45 = vector.load %arg14[%c0_42, %c0_43] : memref<1x64xf32, #tpu.memory_space<vmem>>, vector<1x64xf32>
      %cst_44 = arith.constant 6.250000e-02 : f32
      %46 = vector.broadcast %cst_44 : f32 to vector<1x64xf32>
      %47 = arith.mulf %45, %46 : vector<1x64xf32>
      %48 = tpu.concatenate %44, %47 in 0 : vector<1x64xf32>, vector<1x64xf32> -> vector<2x64xf32>
      %c0_45 = arith.constant 0 : index
      %c0_46 = arith.constant 0 : index
      %c0_47 = arith.constant 0 : index
      %49 = vector.load %arg12[%c0_45, %c0_46, %c0_47] : memref<1x2x64xf32, #tpu.memory_space<vmem>>, vector<1x2x64xf32>
      %50 = vector.shape_cast %49 : vector<1x2x64xf32> to vector<2x64xf32>
      %51 = vector.shape_cast %48 : vector<2x64xf32> to vector<1x2x64xf32>
      tpu.vector_store %arg12[%c0_45, %c0_46, %c0_47], %51 {strides = array<i32>} : memref<1x2x64xf32, #tpu.memory_space<vmem>>, vector<1x2x64xf32>,
    } else {
    }
    return
  }
  func.func @transform_0(%arg0: i32, %arg1: i32) -> (i32, i32, i32) {
    %c0_i32 = arith.constant 0 : i32
    %c0_i32_0 = arith.constant 0 : i32
    return %arg0, %arg1, %c0_i32 : i32, i32, i32
  }
  func.func @transform_1(%arg0: i32, %arg1: i32) -> (i32, i32, i32) {
    %c0_i32 = arith.constant 0 : i32
    %c0_i32_0 = arith.constant 0 : i32
    return %arg0, %arg1, %c0_i32 : i32, i32, i32
  }
  func.func @transform_2(%arg0: i32, %arg1: i32) -> (i32, i32, i32) {
    %c0_i32 = arith.constant 0 : i32
    %c0_i32_0 = arith.constant 0 : i32
    return %arg0, %arg1, %c0_i32 : i32, i32, i32
  }
  func.func @transform_3(%arg0: i32, %arg1: i32) -> (i32, i32, i32) {
    %c0_i32 = arith.constant 0 : i32
    %c0_i32_0 = arith.constant 0 : i32
    return %arg0, %arg1, %c0_i32 : i32, i32, i32
  }
  func.func @transform_4(%arg0: i32, %arg1: i32) -> (i32, i32) {
    %c0_i32 = arith.constant 0 : i32
    %c0_i32_0 = arith.constant 0 : i32
    %c0_i32_1 = arith.constant 0 : i32
    return %c0_i32, %c0_i32_0 : i32, i32
  }
  func.func @transform_5(%arg0: i32, %arg1: i32) -> (i32, i32) {
    %c0_i32 = arith.constant 0 : i32
    %c0_i32_0 = arith.constant 0 : i32
    %c0_i32_1 = arith.constant 0 : i32
    return %c0_i32, %c0_i32_0 : i32, i32
  }
  func.func @transform_6(%arg0: i32, %arg1: i32) -> (i32, i32) {
    %c0_i32 = arith.constant 0 : i32
    %c0_i32_0 = arith.constant 0 : i32
    %c0_i32_1 = arith.constant 0 : i32
    return %c0_i32, %c0_i32_0 : i32, i32
  }
  func.func @transform_7(%arg0: i32, %arg1: i32) -> (i32, i32) {
    %c0_i32 = arith.constant 0 : i32
    %c0_i32_0 = arith.constant 0 : i32
    %c0_i32_1 = arith.constant 0 : i32
    return %c0_i32, %c0_i32_0 : i32, i32
  }
  func.func @transform_8(%arg0: i32, %arg1: i32) -> (i32, i32) {
    %c0_i32 = arith.constant 0 : i32
    %c0_i32_0 = arith.constant 0 : i32
    %c0_i32_1 = arith.constant 0 : i32
    return %c0_i32, %c0_i32_0 : i32, i32
  }
  func.func @transform_9(%arg0: i32, %arg1: i32) -> (i32, i32) {
    %c0_i32 = arith.constant 0 : i32
    %c0_i32_0 = arith.constant 0 : i32
    %c0_i32_1 = arith.constant 0 : i32
    return %c0_i32, %c0_i32_0 : i32, i32
  }
  func.func @transform_10(%arg0: i32, %arg1: i32) -> (i32, i32, i32) {
    %c0_i32 = arith.constant 0 : i32
    %c0_i32_0 = arith.constant 0 : i32
    %c0_i32_1 = arith.constant 0 : i32
    return %arg0, %c0_i32, %c0_i32_0 : i32, i32, i32
  }
}

module attributes {stable_mosaic.version = 11 : i64} {
  func.func @_head_kernel(%arg0: i32, %arg1: memref<2x128xbf16, #tpu.memory_space<vmem>>, %arg2: memref<128x512xbf16, #tpu.memory_space<vmem>>, %arg3: memref<1x512xf32, #tpu.memory_space<vmem>>, %arg4: memref<1x512xf32, #tpu.memory_space<vmem>>, %arg5: memref<512x256xbf16, #tpu.memory_space<vmem>>, %arg6: memref<1x256xf32, #tpu.memory_space<vmem>>, %arg7: memref<1x256xf32, #tpu.memory_space<vmem>>, %arg8: memref<256x40xbf16, #tpu.memory_space<vmem>>, %arg9: memref<1x40xf32, #tpu.memory_space<vmem>>, %arg10: memref<2x40xf32, #tpu.memory_space<vmem>>) attributes {dimension_semantics = [#tpu.dimension_semantics<arbitrary>], iteration_bounds = array<i64: 1>, scalar_prefetch = 0 : i64, scratch_operands = 0 : i64, tpu.core_type = #tpu.core_type<tc>, window_params = [{pipeline_mode = #tpu.pipeline_mode<synchronous>, transform_indices = @transform_0, window_bounds = array<i64: 2, 128>}, {pipeline_mode = #tpu.pipeline_mode<synchronous>, transform_indices = @transform_1, window_bounds = array<i64: 128, 512>}, {pipeline_mode = #tpu.pipeline_mode<synchronous>, transform_indices = @transform_2, window_bounds = array<i64: 1, 512>}, {pipeline_mode = #tpu.pipeline_mode<synchronous>, transform_indices = @transform_3, window_bounds = array<i64: 1, 512>}, {pipeline_mode = #tpu.pipeline_mode<synchronous>, transform_indices = @transform_4, window_bounds = array<i64: 512, 256>}, {pipeline_mode = #tpu.pipeline_mode<synchronous>, transform_indices = @transform_5, window_bounds = array<i64: 1, 256>}, {pipeline_mode = #tpu.pipeline_mode<synchronous>, transform_indices = @transform_6, window_bounds = array<i64: 1, 256>}, {pipeline_mode = #tpu.pipeline_mode<synchronous>, transform_indices = @transform_7, window_bounds = array<i64: 256, 40>}, {pipeline_mode = #tpu.pipeline_mode<synchronous>, transform_indices = @transform_8, window_bounds = array<i64: 1, 40>}, {pipeline_mode = #tpu.pipeline_mode<synchronous>, transform_indices = @transform_9, window_bounds = array<i64: 2, 40>}]} {
    %c0 = arith.constant 0 : index
    %c0_0 = arith.constant 0 : index
    %0 = vector.load %arg1[%c0, %c0_0] : memref<2x128xbf16, #tpu.memory_space<vmem>>, vector<2x128xbf16>
    %c0_1 = arith.constant 0 : index
    %c0_2 = arith.constant 0 : index
    %1 = vector.load %arg2[%c0_1, %c0_2] : memref<128x512xbf16, #tpu.memory_space<vmem>>, vector<128x512xbf16>
    %cst = arith.constant dense<0.000000e+00> : vector<2x512xf32>
    %2 = tpu.matmul %0, %1, %cst {dimension_numbers = #tpu.dot_dimension_numbers<[1], [0], [0], [1], [0, 0, 1, 1], [], []>} : vector<2x128xbf16>, vector<128x512xbf16>, vector<2x512xf32> -> vector<2x512xf32>
    %c0_3 = arith.constant 0 : index
    %c0_4 = arith.constant 0 : index
    %3 = vector.load %arg3[%c0_3, %c0_4] : memref<1x512xf32, #tpu.memory_space<vmem>>, vector<1x512xf32>
    %4 = vector.broadcast %3 : vector<1x512xf32> to vector<2x512xf32>
    %5 = arith.mulf %2, %4 : vector<2x512xf32>
    %c0_5 = arith.constant 0 : index
    %c0_6 = arith.constant 0 : index
    %6 = vector.load %arg4[%c0_5, %c0_6] : memref<1x512xf32, #tpu.memory_space<vmem>>, vector<1x512xf32>
    %7 = vector.broadcast %6 : vector<1x512xf32> to vector<2x512xf32>
    %8 = arith.addf %5, %7 : vector<2x512xf32>
    %cst_7 = arith.constant 2.000000e-01 : f32
    %9 = vector.broadcast %cst_7 : f32 to vector<2x512xf32>
    %10 = arith.mulf %9, %8 : vector<2x512xf32>
    %11 = arith.maximumf %8, %10 : vector<2x512xf32>
    %12 = arith.truncf %11 : vector<2x512xf32> to vector<2x512xbf16>
    %c0_8 = arith.constant 0 : index
    %c0_9 = arith.constant 0 : index
    %13 = vector.load %arg5[%c0_8, %c0_9] : memref<512x256xbf16, #tpu.memory_space<vmem>>, vector<512x256xbf16>
    %cst_10 = arith.constant dense<0.000000e+00> : vector<2x256xf32>
    %14 = tpu.matmul %12, %13, %cst_10 {dimension_numbers = #tpu.dot_dimension_numbers<[1], [0], [0], [1], [0, 0, 1, 1], [], []>} : vector<2x512xbf16>, vector<512x256xbf16>, vector<2x256xf32> -> vector<2x256xf32>
    %c0_11 = arith.constant 0 : index
    %c0_12 = arith.constant 0 : index
    %15 = vector.load %arg6[%c0_11, %c0_12] : memref<1x256xf32, #tpu.memory_space<vmem>>, vector<1x256xf32>
    %16 = vector.broadcast %15 : vector<1x256xf32> to vector<2x256xf32>
    %17 = arith.mulf %14, %16 : vector<2x256xf32>
    %c0_13 = arith.constant 0 : index
    %c0_14 = arith.constant 0 : index
    %18 = vector.load %arg7[%c0_13, %c0_14] : memref<1x256xf32, #tpu.memory_space<vmem>>, vector<1x256xf32>
    %19 = vector.broadcast %18 : vector<1x256xf32> to vector<2x256xf32>
    %20 = arith.addf %17, %19 : vector<2x256xf32>
    %cst_15 = arith.constant 2.000000e-01 : f32
    %21 = vector.broadcast %cst_15 : f32 to vector<2x256xf32>
    %22 = arith.mulf %21, %20 : vector<2x256xf32>
    %23 = arith.maximumf %20, %22 : vector<2x256xf32>
    %24 = arith.truncf %23 : vector<2x256xf32> to vector<2x256xbf16>
    %c0_16 = arith.constant 0 : index
    %c0_17 = arith.constant 0 : index
    %25 = vector.load %arg8[%c0_16, %c0_17] : memref<256x40xbf16, #tpu.memory_space<vmem>>, vector<256x40xbf16>
    %cst_18 = arith.constant dense<0.000000e+00> : vector<2x40xf32>
    %26 = tpu.matmul %24, %25, %cst_18 {dimension_numbers = #tpu.dot_dimension_numbers<[1], [0], [0], [1], [0, 0, 1, 1], [], []>} : vector<2x256xbf16>, vector<256x40xbf16>, vector<2x40xf32> -> vector<2x40xf32>
    %c0_19 = arith.constant 0 : index
    %c0_20 = arith.constant 0 : index
    %27 = vector.load %arg9[%c0_19, %c0_20] : memref<1x40xf32, #tpu.memory_space<vmem>>, vector<1x40xf32>
    %28 = vector.broadcast %27 : vector<1x40xf32> to vector<2x40xf32>
    %29 = arith.addf %26, %28 : vector<2x40xf32>
    %c0_21 = arith.constant 0 : index
    %c0_22 = arith.constant 0 : index
    %30 = vector.load %arg10[%c0_21, %c0_22] : memref<2x40xf32, #tpu.memory_space<vmem>>, vector<2x40xf32>
    tpu.vector_store %arg10[%c0_21, %c0_22], %29 {strides = array<i32>} : memref<2x40xf32, #tpu.memory_space<vmem>>, vector<2x40xf32>,
    return
  }
  func.func @transform_0(%arg0: i32) -> (i32, i32) {
    %c0_i32 = arith.constant 0 : i32
    %c0_i32_0 = arith.constant 0 : i32
    %c0_i32_1 = arith.constant 0 : i32
    return %c0_i32, %c0_i32_0 : i32, i32
  }
  func.func @transform_1(%arg0: i32) -> (i32, i32) {
    %c0_i32 = arith.constant 0 : i32
    %c0_i32_0 = arith.constant 0 : i32
    %c0_i32_1 = arith.constant 0 : i32
    return %c0_i32, %c0_i32_0 : i32, i32
  }
  func.func @transform_2(%arg0: i32) -> (i32, i32) {
    %c0_i32 = arith.constant 0 : i32
    %c0_i32_0 = arith.constant 0 : i32
    %c0_i32_1 = arith.constant 0 : i32
    return %c0_i32, %c0_i32_0 : i32, i32
  }
  func.func @transform_3(%arg0: i32) -> (i32, i32) {
    %c0_i32 = arith.constant 0 : i32
    %c0_i32_0 = arith.constant 0 : i32
    %c0_i32_1 = arith.constant 0 : i32
    return %c0_i32, %c0_i32_0 : i32, i32
  }
  func.func @transform_4(%arg0: i32) -> (i32, i32) {
    %c0_i32 = arith.constant 0 : i32
    %c0_i32_0 = arith.constant 0 : i32
    %c0_i32_1 = arith.constant 0 : i32
    return %c0_i32, %c0_i32_0 : i32, i32
  }
  func.func @transform_5(%arg0: i32) -> (i32, i32) {
    %c0_i32 = arith.constant 0 : i32
    %c0_i32_0 = arith.constant 0 : i32
    %c0_i32_1 = arith.constant 0 : i32
    return %c0_i32, %c0_i32_0 : i32, i32
  }
  func.func @transform_6(%arg0: i32) -> (i32, i32) {
    %c0_i32 = arith.constant 0 : i32
    %c0_i32_0 = arith.constant 0 : i32
    %c0_i32_1 = arith.constant 0 : i32
    return %c0_i32, %c0_i32_0 : i32, i32
  }
  func.func @transform_7(%arg0: i32) -> (i32, i32) {
    %c0_i32 = arith.constant 0 : i32
    %c0_i32_0 = arith.constant 0 : i32
    %c0_i32_1 = arith.constant 0 : i32
    return %c0_i32, %c0_i32_0 : i32, i32
  }
  func.func @transform_8(%arg0: i32) -> (i32, i32) {
    %c0_i32 = arith.constant 0 : i32
    %c0_i32_0 = arith.constant 0 : i32
    %c0_i32_1 = arith.constant 0 : i32
    return %c0_i32, %c0_i32_0 : i32, i32
  }
  func.func @transform_9(%arg0: i32) -> (i32, i32) {
    %c0_i32 = arith.constant 0 : i32
    %c0_i32_0 = arith.constant 0 : i32
    %c0_i32_1 = arith.constant 0 : i32
    return %c0_i32, %c0_i32_0 : i32, i32
  }
}

</mosaic_0001>

<bundles_post_ra>
// kernel: sub.41
= control target key start
LH: loop header
LB: loop body
LE: loop exit
PB: predicated region body
PF: predicated region fallthrough
CT: control target
= control target key end

     0   :  { %vm7_vm0 = vcmask 130048   ;;  %s39_s0 = inlined_call_operand.vmem [shape: f32[32], index: 0, kind: input, shape index: {}]   ;;  %s40_s1 = inlined_call_operand.vmem [shape: f32[2,16], index: 1, kind: output, shape index: {}]  }
   0x1   :  { %v4_v0 = vld [vmem:[%s39_s0] sm:$0x1]  ;;  %s22_s0 = smov 112  }
   0x2   :  { %5 = vst [vmem:[#allocation1] sm:$0x1] %v4_v0 }
   0x9   :  { %v9_v1 = vld [vmem:[#allocation1] sm:$0x1]  }
   0xa   :  { %v6_v2 = vld [vmem:[#allocation1] sm:$0x1]   ;;  %10 = vrot.lane.b32.xlu0 %v9_v1, %s22_s0 }
   0xb   :  { %8 = vst.msk [vmem:[#allocation0] sm:$0x1] %vm7_vm0, %v6_v2  }
  0x7c   :  { %v11_v3 = vpop.permute.xlu0 %10  }
  0x7d   :  { %14 = vst.msk [vmem:[#allocation0 + $0x1] sm:$0x1] %vm7_vm0, %v11_v3  }
  0x84   :  { %v18_v4 = vld [vmem:[#allocation0] sm:$0x3] }
  0x85   :  { %20 = vst [vmem:[%s40_s1] sm:$0x3] %v18_v4 }

// kernel: dgcnn_forward.6
= control target key start
LH: loop header
LB: loop body
LE: loop exit
PB: predicated region body
PF: predicated region fallthrough
CT: control target
= control target key end

     0   :  { %vm47_vm0 = vcmask 1043456   ;;  %vm40_vm1 = vcmask 64512   ;;  %vm280_vm2 = vcmask 523264   ;;  %vm359_vm3 = vcmask 519168   ;;  %s569_s3 = inlined_call_operand.vmem [shape: bf16[8,64], index: 3, kind: input, shape index: {}]   ;;  %s570_s2 = inlined_call_operand.vmem [shape: bf16[8,64], index: 2, kind: input, shape index: {}]   ;;  %s571_s1 = inlined_call_operand.vmem [shape: bf16[32,8], index: 1, kind: input, shape index: {}]   ;;  %s572_s0 = inlined_call_operand.vmem [shape: bf16[4,32,8], index: 0, kind: input, shape index: {}]   ;;  %s573_s4 = inlined_call_operand.vmem [shape: f32[1,64], index: 4, kind: input, shape index: {}]   ;;  %s574_s5 = inlined_call_operand.vmem [shape: f32[1,64], index: 5, kind: input, shape index: {}]   ;;  %s575_s6 = inlined_call_operand.vmem [shape: bf16[32,64], index: 6, kind: output, shape index: {}]  }
   0x1   :  { %v29_v0 = vld [vmem:[%s569_s3] sm:$0xf]  ;;  %v440_v5 = vld [vmem:[%s572_s0 + $0x10] sm:$0xff]   ;;  %v441_v6 = vld [vmem:[%s571_s1 + $0x8] sm:$0xff]  }
   0x2   :  { %v24_v1 = vld [vmem:[%s570_s2] sm:$0xf]  ;;  %436 = vmatprep.subr.msk.bf16.mxu0 %vm47_vm0, %v29_v0  ;;  %v49_v2 = vsel %vm47_vm0, %v29_v0, 0  ;;  %422 = vmatprep.mubr.msk.bf16.mxu1 %vm40_vm1, %v440_v5  ;;  %v442_v7 = vld [vmem:[%s572_s0 + $0x18] sm:$0xff]   ;;  %v445_v10 = vld [vmem:[%s572_s0 + $0x8] sm:$0xff]  }
   0x3   :  { %438 = vmatprep.subr.msk.bf16.mxu1 %vm47_vm0, %v24_v1  ;;  %v181_v3 = vsel %vm47_vm0, %v24_v1, 0  ;;  %v439_v4 = vld [vmem:[%s571_s1] sm:$0xff]   ;;  %411 = vmatpush3.bf16.msra.mxu0 %v49_v2  ;;  %v446_v11 = vld [vmem:[%s572_s0 + $0x28] sm:$0xff]   ;;  %v447_v12 = vld [vmem:[%s572_s0 + $0x30] sm:$0xff]  }
   0x4   :  { %435 = vmatpush3.bf16.msra.mxu1 %v181_v3  ;;  %412 = vmatprep.mubr.msk.bf16.mxu0 %vm40_vm1, %v439_v4  ;;  %v443_v8 = vld [vmem:[%s572_s0] sm:$0xff]   ;;  %v448_v13 = vld [vmem:[%s572_s0 + $0x38] sm:$0xff]  }
   0x5   :  { %437 = vmatprep.subr.msk.bf16.mxu0 %vm47_vm0, %v24_v1  ;;  %v444_v9 = vld [vmem:[%s572_s0 + $0x20] sm:$0xff]  }
   0x6   :  { %413 = vmatmul.mubr.msk.bf16.vlgmr.msra.gmra.mrb[0].mxu0 %vm40_vm1, %v441_v6  ;;  %v388_v56 = vld [vmem:[%s573_s4] ss:$0 sm:$0xff] }
   0x7   :  { %423 = vmatmul.mubr.msk.bf16.vlgmr.msra.gmra.mrb[0].mxu1 %vm40_vm1, %v442_v7  ;;  %417 = vmatpush3.bf16.msra.mxu0 %v181_v3  ;;  %v389_v63 = vld [vmem:[%s574_s5] ss:$0 sm:$0xff] }
   0x8   :  { %418 = vmatprep.mubr.msk.bf16.mxu0 %vm40_vm1, %v443_v8  ;;  %426 = vmatprep.mubr.msk.bf16.mxu1 %vm40_vm1, %v444_v9 }
   0xe   :  { %419 = vmatmul.mubr.msk.bf16.vlgmr.msra.gmra.mrb[4].mxu0 %vm40_vm1, %v445_v10 }
   0xf   :  { %427 = vmatmul.mubr.msk.bf16.gmra.mrb[4].mxu1 %vm40_vm1, %v446_v11 }
  0x10   :  { %430 = vmatprep.mubr.msk.bf16.mxu1 %vm40_vm1, %v447_v12 }
  0x17   :  { %431 = vmatmul.mubr.msk.bf16.gmra.mrb[8].mxu1 %vm40_vm1, %v448_v13 }
  0xd9   :  { %v414_v14 = vpop.f32.mrb[0].mxu0 }
  0xda   :  { %v424_v15 = vpop.f32.mrb[0].mxu1  ;;  %v85_v16 = vpop.f32.mrb[1].mxu0 }
  0xdb   :  { %v233_v17 = vpop.f32.mrb[1].mxu1  ;;  %v415_v18 = vpop.f32.mrb[2].mxu0  ;;  %v296_v23 = vsel %vm280_vm2, %v424_v15, -inf }
  0xdc   :  { %v425_v19 = vpop.f32.mrb[2].mxu1  ;;  %v88_v20 = vpop.f32.mrb[3].mxu0  ;;  %v282_v27 = vsel %vm280_vm2, %v233_v17, -inf }
  0xdd   :  { %v236_v21 = vpop.f32.mrb[3].mxu1  ;;  %v303_v28 = vsel %vm280_vm2, %v425_v19, -inf }
  0xde   :  { %v289_v33 = vsel %vm280_vm2, %v236_v21, -inf }
  0xe1   :  { %v420_v22 = vpop.f32.mrb[4].mxu0 }
  0xe2   :  { %v295_v24 = vsel %vm280_vm2, %v420_v22, -inf  ;;  %v428_v25 = vpop.f32.mrb[4].mxu1  ;;  %v217_v26 = vpop.f32.mrb[5].mxu0 }
  0xe3   :  { %v297_v29 = vmax.f32 %v295_v24, %v296_v23  ;;  %v281_v30 = vsel %vm280_vm2, %v217_v26, -inf  ;;  %v249_v31 = vpop.f32.mrb[5].mxu1  ;;  %v421_v32 = vpop.f32.mrb[6].mxu0  ;;  %v298_v34 = vsel %vm280_vm2, %v428_v25, -inf }
  0xe4   :  { %v283_v35 = vmax.f32 %v281_v30, %v282_v27  ;;  %v302_v36 = vsel %vm280_vm2, %v421_v32, -inf  ;;  %v429_v37 = vpop.f32.mrb[6].mxu1  ;;  %v220_v38 = vpop.f32.mrb[7].mxu0  ;;  %v284_v40 = vsel %vm280_vm2, %v249_v31, -inf }
  0xe5   :  { %v299_v39 = vmax.f32 %v297_v29, %v298_v34  ;;  %v304_v41 = vmax.f32 %v302_v36, %v303_v28  ;;  %v288_v42 = vsel %vm280_vm2, %v220_v38, -inf  ;;  %v252_v43 = vpop.f32.mrb[7].mxu1  ;;  %v305_v45 = vsel %vm280_vm2, %v429_v37, -inf }
  0xe6   :  { %v285_v44 = vmax.f32 %v283_v35, %v284_v40  ;;  %v290_v46 = vmax.f32 %v288_v42, %v289_v33  ;;  %v291_v48 = vsel %vm280_vm2, %v252_v43, -inf }
  0xe7   :  { %v306_v47 = vmax.f32 %v304_v41, %v305_v45 }
  0xe8   :  { %v292_v49 = vmax.f32 %v290_v46, %v291_v48 }
  0xea   :  { %v432_v50 = vpop.f32.mrb[8].mxu1 }
  0xeb   :  { %v300_v51 = vsel %vm280_vm2, %v432_v50, -inf  ;;  %v265_v52 = vpop.f32.mrb[9].mxu1 }
  0xec   :  { %v301_v53 = vmax.f32 %v299_v39, %v300_v51  ;;  %v286_v54 = vsel %vm280_vm2, %v265_v52, -inf  ;;  %v433_v55 = vpop.f32.mrb[10].mxu1 }
  0xed   :  { %v287_v57 = vmax.f32 %v285_v44, %v286_v54  ;;  %v307_v58 = vsel %vm280_vm2, %v433_v55, -inf  ;;  %v268_v59 = vpop.f32.mrb[11].mxu1 }
  0xee   :  { %v311_v60 = vadd.f32 %v414_v14, %v301_v53  ;;  %v308_v61 = vmax.f32 %v306_v47, %v307_v58  ;;  %v293_v62 = vsel %vm280_vm2, %v268_v59, -inf }
  0xef   :  { %v309_v0 = vadd.f32 %v287_v57, %v85_v16  ;;  %v294_v1 = vmax.f32 %v292_v49, %v293_v62 }
  0xf0   :  { %v322_v2 = vmul.f32 %v388_v56, %v311_v60  ;;  %v312_v3 = vadd.f32 %v415_v18, %v308_v61 }
  0xf1   :  { %v320_v4 = vmul.f32 %v388_v56, %v309_v0  ;;  %v310_v5 = vadd.f32 %v294_v1, %v88_v20 }
  0xf2   :  { %v333_v6 = vadd.f32 %v389_v63, %v322_v2  ;;  %v323_v7 = vmul.f32 %v388_v56, %v312_v3 }
  0xf3   :  { %v331_v8 = vadd.f32 %v389_v63, %v320_v4  ;;  %v321_v9 = vmul.f32 %v388_v56, %v310_v5 }
  0xf4   :  { %v337_v10 = vmul.f32 0.2, %v333_v6  ;;  %v334_v11 = vadd.f32 %v389_v63, %v323_v7 }
  0xf5   :  { %v335_v12 = vmul.f32 0.2, %v331_v8  ;;  %v332_v13 = vadd.f32 %v389_v63, %v321_v9 }
  0xf6   :  { %v341_v14 = vmax.f32 %v333_v6, %v337_v10  ;;  %v338_v15 = vmul.f32 0.2, %v334_v11 }
  0xf7   :  { %v339_v17 = vmax.f32 %v331_v8, %v335_v12  ;;  %v336_v19 = vmul.f32 0.2, %v332_v13 }
  0xf8   :  { %v396_v21 = vpack.c.bf16 %v341_v14, %v341_v14  ;;  %v342_v16 = vmax.f32 %v334_v11, %v338_v15 }
  0xf9   :  { %v394_v22 = vpack.c.bf16 %v339_v17, %v339_v17  ;;  %v340_v23 = vmax.f32 %v332_v13, %v336_v19 }
  0xfa   :  { %362 = vst.msk [vmem:[%s575_s6 + $0x8] sm:$0xf] %vm359_vm3, %v396_v21  ;;  %v397_v18 = vpack.c.bf16 %v342_v16, %v342_v16 }
  0xfb   :  { %360 = vst.msk [vmem:[%s575_s6] sm:$0xf] %vm359_vm3, %v394_v22  ;;  %v395_v20 = vpack.c.bf16 %v340_v23, %v340_v23 }
  0xfc   :  { %363 = vst.msk [vmem:[%s575_s6 + $0xc] sm:$0xf] %vm359_vm3, %v397_v18 }
  0xfd   :  { %361 = vst.msk [vmem:[%s575_s6 + $0x4] sm:$0xf] %vm359_vm3, %v395_v20 }

// kernel: dgcnn_forward.7
= control target key start
LH: loop header
LB: loop body
LE: loop exit
PB: predicated region body
PF: predicated region fallthrough
CT: control target
= control target key end

     0   :  { %vm78_vm0 = vcmask 523264   ;;  %vm413_vm1 = vcmask 519168   ;;  %s673_s3 = inlined_call_operand.vmem [shape: bf16[64,64], index: 3, kind: input, shape index: {}]   ;;  %s674_s2 = inlined_call_operand.vmem [shape: bf16[64,64], index: 2, kind: input, shape index: {}]   ;;  %s675_s1 = inlined_call_operand.vmem [shape: bf16[32,64], index: 1, kind: input, shape index: {}]   ;;  %s676_s0 = inlined_call_operand.vmem [shape: bf16[4,32,64], index: 0, kind: input, shape index: {}]   ;;  %s677_s4 = inlined_call_operand.vmem [shape: f32[1,64], index: 4, kind: input, shape index: {}]   ;;  %s678_s5 = inlined_call_operand.vmem [shape: f32[1,64], index: 5, kind: input, shape index: {}]   ;;  %s679_s6 = inlined_call_operand.vmem [shape: bf16[32,64], index: 6, kind: output, shape index: {}]  }
   0x1   :  { %v522_v0 = vld [vmem:[%s673_s3] sm:$0xff]   ;;  %v524_v2 = vld [vmem:[%s673_s3 + $0x8] sm:$0xff]   ;;  %v526_v4 = vld [vmem:[%s673_s3 + $0x10] sm:$0xff]  }
   0x2   :  { %v523_v1 = vld [vmem:[%s674_s2] sm:$0xff]   ;;  %478 = vmatprep.subr.bf16.mxu0 %v522_v0  ;;  %v525_v3 = vld [vmem:[%s674_s2 + $0x8] sm:$0xff]   ;;  %v527_v5 = vld [vmem:[%s674_s2 + $0x10] sm:$0xff]  }
   0x3   :  { %479 = vmatpush3.bf16.msra.mxu0 %v522_v0  ;;  %514 = vmatprep.subr.bf16.mxu1 %v523_v1  ;;  %v528_v6 = vld [vmem:[%s673_s3 + $0x18] sm:$0xff]   ;;  %v530_v7 = vld [vmem:[%s675_s1] sm:$0xff]   ;;  %v532_v9 = vld [vmem:[%s676_s0 + $0x10] sm:$0xff]  }
   0x4   :  { %518 = vmatpush3.bf16.msra.mxu1 %v523_v1  ;;  %480 = vmatprep.subr.bf16.mxu0 %v524_v2  ;;  %v529_v8 = vld [vmem:[%s674_s2 + $0x18] sm:$0xff]   ;;  %v531_v10 = vld [vmem:[%s675_s1 + $0x8] sm:$0xff]   ;;  %v534_v12 = vld [vmem:[%s676_s0 + $0x20] sm:$0xff]  }
   0x5   :  { %515 = vmatprep.subr.bf16.mxu1 %v525_v3  ;;  %486 = vmatprep.mubr.msk.bf16.mxu0 %vm78_vm0, %v530_v7  ;;  %v533_v11 = vld [vmem:[%s676_s0 + $0x18] sm:$0xff]   ;;  %v536_v13 = vld [vmem:[%s676_s0] sm:$0xff]   ;;  %v535_v14 = vld [vmem:[%s676_s0 + $0x28] sm:$0xff]  }
   0x6   :  { %502 = vmatprep.mubr.msk.bf16.mxu1 %vm78_vm0, %v532_v9  ;;  %v538_v15 = vld [vmem:[%s676_s0 + $0x30] sm:$0xff]   ;;  %v537_v16 = vld [vmem:[%s676_s0 + $0x8] sm:$0xff]   ;;  %v539_v17 = vld [vmem:[%s676_s0 + $0x38] sm:$0xff]  }
   0x7   :  { %481 = vmatpush3.bf16.msra.mxu0 %v524_v2  ;;  %v450_v60 = vld [vmem:[%s677_s4] ss:$0 sm:$0xff] }
   0x8   :  { %519 = vmatpush3.bf16.msra.mxu1 %v525_v3  ;;  %482 = vmatprep.subr.bf16.mxu0 %v526_v4 }
   0x9   :  { %516 = vmatprep.subr.bf16.mxu1 %v527_v5 }
   0xb   :  { %483 = vmatpush3.bf16.msra.mxu0 %v526_v4 }
   0xc   :  { %520 = vmatpush3.bf16.msra.mxu1 %v527_v5  ;;  %484 = vmatprep.subr.bf16.mxu0 %v528_v6 }
   0xd   :  { %517 = vmatprep.subr.bf16.mxu1 %v529_v8 }
   0xf   :  { %485 = vmatpush3.bf16.msra.mxu0 %v528_v6 }
  0x10   :  { %521 = vmatpush3.bf16.msra.mxu1 %v529_v8  ;;  %490 = vmatprep.subr.bf16.mxu0 %v523_v1 }
  0x12   :  { %487 = vmatmul.mubr.msk.bf16.vlgmr.msra.gmra.mrb[0].mxu0 %vm78_vm0, %v531_v10 }
  0x13   :  { %491 = vmatpush3.bf16.msra.mxu0 %v523_v1  ;;  %503 = vmatmul.mubr.msk.bf16.vlgmr.msra.gmra.mrb[0].mxu1 %vm78_vm0, %v533_v11 }
  0x14   :  { %492 = vmatprep.subr.bf16.mxu0 %v525_v3  ;;  %506 = vmatprep.mubr.msk.bf16.mxu1 %vm78_vm0, %v534_v12 }
  0x15   :  { %498 = vmatprep.mubr.msk.bf16.mxu0 %vm78_vm0, %v536_v13 }
  0x17   :  { %493 = vmatpush3.bf16.msra.mxu0 %v525_v3  ;;  %v451_v3 = vld [vmem:[%s678_s5] ss:$0 sm:$0xff] }
  0x18   :  { %494 = vmatprep.subr.bf16.mxu0 %v527_v5 }
  0x1b   :  { %495 = vmatpush3.bf16.msra.mxu0 %v527_v5  ;;  %507 = vmatmul.mubr.msk.bf16.gmra.mrb[4].mxu1 %vm78_vm0, %v535_v14 }
  0x1c   :  { %496 = vmatprep.subr.bf16.mxu0 %v529_v8  ;;  %510 = vmatprep.mubr.msk.bf16.mxu1 %vm78_vm0, %v538_v15 }
  0x1f   :  { %497 = vmatpush3.bf16.msra.mxu0 %v529_v8 }
  0x22   :  { %499 = vmatmul.mubr.msk.bf16.vlgmr.msra.gmra.mrb[4].mxu0 %vm78_vm0, %v537_v16 }
  0x23   :  { %511 = vmatmul.mubr.msk.bf16.gmra.mrb[8].mxu1 %vm78_vm0, %v539_v17 }
  0xe5   :  { %v488_v18 = vpop.f32.mrb[0].mxu0 }
  0xe6   :  { %v119_v19 = vpop.f32.mrb[1].mxu0  ;;  %v504_v20 = vpop.f32.mrb[0].mxu1 }
  0xe7   :  { %v489_v21 = vpop.f32.mrb[2].mxu0  ;;  %v288_v22 = vpop.f32.mrb[1].mxu1  ;;  %v350_v31 = vsel %vm78_vm0, %v504_v20, -inf }
  0xe8   :  { %v122_v23 = vpop.f32.mrb[3].mxu0  ;;  %v505_v24 = vpop.f32.mrb[2].mxu1  ;;  %v336_v32 = vsel %vm78_vm0, %v288_v22, -inf }
  0xe9   :  { %v291_v25 = vpop.f32.mrb[3].mxu1  ;;  %v357_v33 = vsel %vm78_vm0, %v505_v24, -inf }
  0xea   :  { %v343_v37 = vsel %vm78_vm0, %v291_v25, -inf }
  0xee   :  { %v508_v26 = vpop.f32.mrb[4].mxu1 }
  0xef   :  { %v304_v27 = vpop.f32.mrb[5].mxu1  ;;  %v352_v38 = vsel %vm78_vm0, %v508_v26, -inf }
  0xf0   :  { %v509_v28 = vpop.f32.mrb[6].mxu1  ;;  %v338_v43 = vsel %vm78_vm0, %v304_v27, -inf }
  0xf1   :  { %v307_v29 = vpop.f32.mrb[7].mxu1  ;;  %v359_v54 = vsel %vm78_vm0, %v509_v28, -inf }
  0xf2   :  { %v345_v57 = vsel %vm78_vm0, %v307_v29, -inf }
  0xf5   :  { %v500_v30 = vpop.f32.mrb[4].mxu0 }
  0xf6   :  { %v349_v34 = vsel %vm78_vm0, %v500_v30, -inf  ;;  %v272_v35 = vpop.f32.mrb[5].mxu0  ;;  %v512_v36 = vpop.f32.mrb[8].mxu1 }
  0xf7   :  { %v351_v39 = vmax.f32 %v349_v34, %v350_v31  ;;  %v335_v40 = vsel %vm78_vm0, %v272_v35, -inf  ;;  %v501_v41 = vpop.f32.mrb[6].mxu0  ;;  %v320_v42 = vpop.f32.mrb[9].mxu1  ;;  %v354_v45 = vsel %vm78_vm0, %v512_v36, -inf }
  0xf8   :  { %v337_v44 = vmax.f32 %v335_v40, %v336_v32  ;;  %v356_v46 = vsel %vm78_vm0, %v501_v41, -inf  ;;  %v275_v47 = vpop.f32.mrb[7].mxu0  ;;  %v513_v48 = vpop.f32.mrb[10].mxu1  ;;  %v340_v51 = vsel %vm78_vm0, %v320_v42, -inf }
  0xf9   :  { %v353_v49 = vmax.f32 %v351_v39, %v352_v38  ;;  %v358_v50 = vmax.f32 %v356_v46, %v357_v33  ;;  %v342_v52 = vsel %vm78_vm0, %v275_v47, -inf  ;;  %v323_v53 = vpop.f32.mrb[11].mxu1  ;;  %v361_v62 = vsel %vm78_vm0, %v513_v48, -inf }
  0xfa   :  { %v339_v55 = vmax.f32 %v337_v44, %v338_v43  ;;  %v344_v56 = vmax.f32 %v342_v52, %v343_v37  ;;  %v347_v2 = vsel %vm78_vm0, %v323_v53, -inf }
  0xfb   :  { %v355_v58 = vmax.f32 %v353_v49, %v354_v45  ;;  %v360_v59 = vmax.f32 %v358_v50, %v359_v54 }
  0xfc   :  { %v341_v61 = vmax.f32 %v339_v55, %v340_v51  ;;  %v346_v63 = vmax.f32 %v344_v56, %v345_v57 }
  0xfd   :  { %v365_v0 = vadd.f32 %v488_v18, %v355_v58  ;;  %v362_v1 = vmax.f32 %v360_v59, %v361_v62 }
  0xfe   :  { %v363_v4 = vadd.f32 %v341_v61, %v119_v19  ;;  %v348_v5 = vmax.f32 %v346_v63, %v347_v2 }
  0xff   :  { %v376_v6 = vmul.f32 %v450_v60, %v365_v0  ;;  %v366_v7 = vadd.f32 %v489_v21, %v362_v1 }
 0x100   :  { %v374_v8 = vmul.f32 %v450_v60, %v363_v4  ;;  %v364_v9 = vadd.f32 %v348_v5, %v122_v23 }
 0x101   :  { %v387_v10 = vadd.f32 %v451_v3, %v376_v6  ;;  %v377_v11 = vmul.f32 %v450_v60, %v366_v7 }
 0x102   :  { %v385_v12 = vadd.f32 %v451_v3, %v374_v8  ;;  %v375_v13 = vmul.f32 %v450_v60, %v364_v9 }
 0x103   :  { %v391_v14 = vmul.f32 0.2, %v387_v10  ;;  %v388_v15 = vadd.f32 %v451_v3, %v377_v11 }
 0x104   :  { %v389_v16 = vmul.f32 0.2, %v385_v12  ;;  %v386_v17 = vadd.f32 %v451_v3, %v375_v13 }
 0x105   :  { %v395_v18 = vmax.f32 %v387_v10, %v391_v14  ;;  %v392_v20 = vmul.f32 0.2, %v388_v15 }
 0x106   :  { %v393_v22 = vmax.f32 %v385_v12, %v389_v16  ;;  %v390_v24 = vmul.f32 0.2, %v386_v17 }
 0x107   :  { %v458_v25 = vpack.c.bf16 %v395_v18, %v395_v18  ;;  %v396_v19 = vmax.f32 %v388_v15, %v392_v20 }
 0x108   :  { %v456_v26 = vpack.c.bf16 %v393_v22, %v393_v22  ;;  %v394_v27 = vmax.f32 %v386_v17, %v390_v24 }
 0x109   :  { %416 = vst.msk [vmem:[%s679_s6 + $0x8] sm:$0xf] %vm413_vm1, %v458_v25  ;;  %v459_v21 = vpack.c.bf16 %v396_v19, %v396_v19 }
 0x10a   :  { %414 = vst.msk [vmem:[%s679_s6] sm:$0xf] %vm413_vm1, %v456_v26  ;;  %v457_v23 = vpack.c.bf16 %v394_v27, %v394_v27 }
 0x10b   :  { %417 = vst.msk [vmem:[%s679_s6 + $0xc] sm:$0xf] %vm413_vm1, %v459_v21 }
 0x10c   :  { %415 = vst.msk [vmem:[%s679_s6 + $0x4] sm:$0xf] %vm413_vm1, %v457_v23 }

// kernel: dgcnn_forward.8
= control target key start
LH: loop header
LB: loop body
LE: loop exit
PB: predicated region body
PF: predicated region fallthrough
CT: control target
= control target key end

     0   :  { %vm78_vm0 = vcmask 523264   ;;  %s645_s3 = inlined_call_operand.vmem [shape: bf16[64,128], index: 3, kind: input, shape index: {}]   ;;  %s646_s2 = inlined_call_operand.vmem [shape: bf16[64,128], index: 2, kind: input, shape index: {}]   ;;  %s647_s1 = inlined_call_operand.vmem [shape: bf16[32,64], index: 1, kind: input, shape index: {}]   ;;  %s648_s0 = inlined_call_operand.vmem [shape: bf16[4,32,64], index: 0, kind: input, shape index: {}]   ;;  %s649_s4 = inlined_call_operand.vmem [shape: f32[1,128], index: 4, kind: input, shape index: {}]   ;;  %s650_s5 = inlined_call_operand.vmem [shape: f32[1,128], index: 5, kind: input, shape index: {}]   ;;  %s651_s6 = inlined_call_operand.vmem [shape: bf16[32,128], index: 6, kind: output, shape index: {}]  }
   0x1   :  { %v516_v0 = vld [vmem:[%s645_s3] sm:$0xff]   ;;  %v518_v2 = vld [vmem:[%s645_s3 + $0x8] sm:$0xff]   ;;  %v520_v4 = vld [vmem:[%s645_s3 + $0x10] sm:$0xff]  }
   0x2   :  { %v517_v1 = vld [vmem:[%s646_s2] sm:$0xff]   ;;  %472 = vmatprep.subr.bf16.mxu0 %v516_v0  ;;  %v519_v3 = vld [vmem:[%s646_s2 + $0x8] sm:$0xff]   ;;  %v521_v5 = vld [vmem:[%s646_s2 + $0x10] sm:$0xff]  }
   0x3   :  { %473 = vmatpush3.bf16.msra.mxu0 %v516_v0  ;;  %508 = vmatprep.subr.bf16.mxu1 %v517_v1  ;;  %v522_v6 = vld [vmem:[%s645_s3 + $0x18] sm:$0xff]   ;;  %v524_v7 = vld [vmem:[%s647_s1] sm:$0xff]   ;;  %v526_v9 = vld [vmem:[%s648_s0 + $0x10] sm:$0xff]  }
   0x4   :  { %512 = vmatpush3.bf16.msra.mxu1 %v517_v1  ;;  %474 = vmatprep.subr.bf16.mxu0 %v518_v2  ;;  %v523_v8 = vld [vmem:[%s646_s2 + $0x18] sm:$0xff]   ;;  %v525_v10 = vld [vmem:[%s647_s1 + $0x8] sm:$0xff]   ;;  %v528_v12 = vld [vmem:[%s648_s0 + $0x20] sm:$0xff]  }
   0x5   :  { %509 = vmatprep.subr.bf16.mxu1 %v519_v3  ;;  %480 = vmatprep.mubr.msk.bf16.mxu0 %vm78_vm0, %v524_v7  ;;  %v527_v11 = vld [vmem:[%s648_s0 + $0x18] sm:$0xff]   ;;  %v530_v13 = vld [vmem:[%s648_s0] sm:$0xff]   ;;  %v529_v14 = vld [vmem:[%s648_s0 + $0x28] sm:$0xff]  }
   0x6   :  { %496 = vmatprep.mubr.msk.bf16.mxu1 %vm78_vm0, %v526_v9  ;;  %v532_v15 = vld [vmem:[%s648_s0 + $0x30] sm:$0xff]   ;;  %v531_v16 = vld [vmem:[%s648_s0 + $0x8] sm:$0xff]   ;;  %v533_v17 = vld [vmem:[%s648_s0 + $0x38] sm:$0xff]  }
   0x7   :  { %475 = vmatpush3.bf16.msra.mxu0 %v518_v2  ;;  %v433_v46 = vld [vmem:[%s649_s4] ss:$0 sm:$0xff] }
   0x8   :  { %513 = vmatpush3.bf16.msra.mxu1 %v519_v3  ;;  %476 = vmatprep.subr.bf16.mxu0 %v520_v4  ;;  %v434_v51 = vld [vmem:[%s650_s5] ss:$0 sm:$0xff] }
   0x9   :  { %510 = vmatprep.subr.bf16.mxu1 %v521_v5 }
   0xb   :  { %477 = vmatpush3.bf16.msra.mxu0 %v520_v4 }
   0xc   :  { %514 = vmatpush3.bf16.msra.mxu1 %v521_v5  ;;  %478 = vmatprep.subr.bf16.mxu0 %v522_v6 }
   0xd   :  { %511 = vmatprep.subr.bf16.mxu1 %v523_v8 }
   0xf   :  { %479 = vmatpush3.bf16.msra.mxu0 %v522_v6 }
  0x10   :  { %515 = vmatpush3.bf16.msra.mxu1 %v523_v8  ;;  %484 = vmatprep.subr.bf16.mxu0 %v517_v1 }
  0x12   :  { %481 = vmatmul.mubr.msk.bf16.vlgmr.msra.gmra.mrb[0].mxu0 %vm78_vm0, %v525_v10 }
  0x13   :  { %485 = vmatpush3.bf16.msra.mxu0 %v517_v1  ;;  %497 = vmatmul.mubr.msk.bf16.vlgmr.msra.gmra.mrb[0].mxu1 %vm78_vm0, %v527_v11 }
  0x14   :  { %486 = vmatprep.subr.bf16.mxu0 %v519_v3  ;;  %500 = vmatprep.mubr.msk.bf16.mxu1 %vm78_vm0, %v528_v12 }
  0x15   :  { %492 = vmatprep.mubr.msk.bf16.mxu0 %vm78_vm0, %v530_v13 }
  0x17   :  { %487 = vmatpush3.bf16.msra.mxu0 %v519_v3 }
  0x18   :  { %488 = vmatprep.subr.bf16.mxu0 %v521_v5 }
  0x1b   :  { %489 = vmatpush3.bf16.msra.mxu0 %v521_v5  ;;  %501 = vmatmul.mubr.msk.bf16.gmra.mrb[4].mxu1 %vm78_vm0, %v529_v14 }
  0x1c   :  { %490 = vmatprep.subr.bf16.mxu0 %v523_v8  ;;  %504 = vmatprep.mubr.msk.bf16.mxu1 %vm78_vm0, %v532_v15 }
  0x1f   :  { %491 = vmatpush3.bf16.msra.mxu0 %v523_v8 }
  0x22   :  { %493 = vmatmul.mubr.msk.bf16.vlgmr.msra.gmra.mrb[4].mxu0 %vm78_vm0, %v531_v16 }
  0x23   :  { %505 = vmatmul.mubr.msk.bf16.gmra.mrb[8].mxu1 %vm78_vm0, %v533_v17 }
  0xe5   :  { %v482_v18 = vpop.f32.mrb[0].mxu0 }
  0xe6   :  { %v119_v19 = vpop.f32.mrb[1].mxu0  ;;  %v498_v20 = vpop.f32.mrb[0].mxu1 }
  0xe7   :  { %v483_v21 = vpop.f32.mrb[2].mxu0  ;;  %v288_v22 = vpop.f32.mrb[1].mxu1 }
  0xe8   :  { %v122_v23 = vpop.f32.mrb[3].mxu0  ;;  %v499_v24 = vpop.f32.mrb[2].mxu1 }
  0xe9   :  { %v291_v25 = vpop.f32.mrb[3].mxu1 }
  0xee   :  { %v502_v26 = vpop.f32.mrb[4].mxu1 }
  0xef   :  { %v304_v27 = vpop.f32.mrb[5].mxu1 }
  0xf0   :  { %v503_v28 = vpop.f32.mrb[6].mxu1 }
  0xf1   :  { %v307_v29 = vpop.f32.mrb[7].mxu1 }
  0xf5   :  { %v494_v30 = vpop.f32.mrb[4].mxu0 }
  0xf6   :  { %v341_v31 = vmax.f32 %v494_v30, %v498_v20  ;;  %v272_v32 = vpop.f32.mrb[5].mxu0  ;;  %v506_v33 = vpop.f32.mrb[8].mxu1 }
  0xf7   :  { %v335_v34 = vmax.f32 %v272_v32, %v288_v22  ;;  %v495_v35 = vpop.f32.mrb[6].mxu0  ;;  %v320_v36 = vpop.f32.mrb[9].mxu1 }
  0xf8   :  { %v342_v37 = vmax.f32 %v341_v31, %v502_v26  ;;  %v344_v38 = vmax.f32 %v495_v35, %v499_v24  ;;  %v275_v39 = vpop.f32.mrb[7].mxu0  ;;  %v507_v40 = vpop.f32.mrb[10].mxu1 }
  0xf9   :  { %v336_v41 = vmax.f32 %v335_v34, %v304_v27  ;;  %v338_v42 = vmax.f32 %v275_v39, %v291_v25  ;;  %v323_v43 = vpop.f32.mrb[11].mxu1 }
  0xfa   :  { %v343_v44 = vmax.f32 %v342_v37, %v506_v33  ;;  %v345_v45 = vmax.f32 %v344_v38, %v503_v28 }
  0xfb   :  { %v337_v47 = vmax.f32 %v336_v41, %v320_v36  ;;  %v339_v48 = vmax.f32 %v338_v42, %v307_v29 }
  0xfc   :  { %v349_v49 = vadd.f32 %v482_v18, %v343_v44  ;;  %v346_v50 = vmax.f32 %v345_v45, %v507_v40 }
  0xfd   :  { %v347_v52 = vadd.f32 %v337_v47, %v119_v19  ;;  %v340_v53 = vmax.f32 %v339_v48, %v323_v43 }
  0xfe   :  { %v360_v54 = vmul.f32 %v433_v46, %v349_v49  ;;  %v350_v55 = vadd.f32 %v483_v21, %v346_v50 }
  0xff   :  { %v358_v56 = vmul.f32 %v433_v46, %v347_v52  ;;  %v348_v57 = vadd.f32 %v340_v53, %v122_v23 }
 0x100   :  { %v371_v58 = vadd.f32 %v434_v51, %v360_v54  ;;  %v361_v59 = vmul.f32 %v433_v46, %v350_v55 }
 0x101   :  { %v369_v60 = vadd.f32 %v434_v51, %v358_v56  ;;  %v359_v61 = vmul.f32 %v433_v46, %v348_v57 }
 0x102   :  { %v375_v62 = vmul.f32 0.2, %v371_v58  ;;  %v372_v63 = vadd.f32 %v434_v51, %v361_v59 }
 0x103   :  { %v373_v0 = vmul.f32 0.2, %v369_v60  ;;  %v370_v1 = vadd.f32 %v434_v51, %v359_v61 }
 0x104   :  { %v376_v2 = vmul.f32 0.2, %v372_v63  ;;  %v379_v4 = vmax.f32 %v371_v58, %v375_v62 }
 0x105   :  { %v374_v3 = vmul.f32 0.2, %v370_v1  ;;  %v377_v6 = vmax.f32 %v369_v60, %v373_v0 }
 0x106   :  { %v380_v5 = vmax.f32 %v372_v63, %v376_v2 }
 0x107   :  { %v378_v7 = vmax.f32 %v370_v1, %v374_v3 }
 0x108   :  { %v451_v8 = vpack.c.bf16 %v380_v5, %v379_v4 }
 0x109   :  { %v446_v9 = vpack.c.bf16 %v378_v7, %v377_v6 }
 0x10a   :  { %453 = vst [vmem:[%s651_s6 + $0x8] sm:$0xff] %v451_v8  }
 0x10b   :  { %447 = vst [vmem:[%s651_s6] sm:$0xff] %v446_v9  }

// kernel: dgcnn_forward.9
= control target key start
LH: loop header
LB: loop body
LE: loop exit
PB: predicated region body
PF: predicated region fallthrough
CT: control target
= control target key end

     0   :  { %v707_v1 = vmov 0   ;;  %v496_v63 = vlaneseq  ;;  %s933_s3 = inlined_call_operand.vmem [shape: bf16[128,256], index: 3, kind: input, shape index: {}]   ;;  %s934_s2 = inlined_call_operand.vmem [shape: bf16[128,256], index: 2, kind: input, shape index: {}]   ;;  %s935_s1 = inlined_call_operand.vmem [shape: bf16[32,128], index: 1, kind: input, shape index: {}]   ;;  %s936_s0 = inlined_call_operand.vmem [shape: bf16[4,32,128], index: 0, kind: input, shape index: {}]   ;;  %s937_s4 = inlined_call_operand.vmem [shape: f32[1,256], index: 4, kind: input, shape index: {}]   ;;  %s938_s5 = inlined_call_operand.vmem [shape: f32[1,256], index: 5, kind: input, shape index: {}]   ;;  %s939_s6 = inlined_call_operand.vmem [shape: bf16[32,256], index: 6, kind: output, shape index: {}]  }
   0x1   :  { %v649_v0 = vld [vmem:[%s933_s3 + $0x4] ss:$8 sps:$4 sm:$0xff]   ;;  %184 = vmatprep.mubr.bf16.mxu0 %v707_v1  ;;  %401 = vmatprep.mubr.bf16.mxu1 %v707_v1  ;;  %v651_v2 = vld [vmem:[%s933_s3] ss:$8 sps:$4 sm:$0xff]   ;;  %v655_v5 = vld [vmem:[%s933_s3 + $0x14] ss:$8 sps:$4 sm:$0xff]  }
   0x2   :  { %152 = vmatprep.subr.bf16.mxu0 %v649_v0  ;;  %v652_v3 = vld [vmem:[%s934_s2 + $0x4] ss:$8 sps:$4 sm:$0xff]   ;;  %v757_v4 = vld [vmem:[%s934_s2] ss:$8 sps:$4 sm:$0xff]   ;;  %v657_v6 = vld [vmem:[%s933_s3 + $0x10] ss:$8 sps:$4 sm:$0xff]  }
   0x3   :  { %153 = vmatpush1.bf16.msra.mxu0 %v651_v2  ;;  %632 = vmatprep.subr.bf16.mxu1 %v652_v3  ;;  %v768_v7 = vld [vmem:[%s934_s2 + $0x14] ss:$8 sps:$4 sm:$0xff]   ;;  %v774_v8 = vld [vmem:[%s934_s2 + $0x10] ss:$8 sps:$4 sm:$0xff]   ;;  %v661_v9 = vld [vmem:[%s933_s3 + $0x24] ss:$8 sps:$4 sm:$0xff]  }
   0x4   :  { %640 = vmatpush1.bf16.msra.mxu1 %v757_v4  ;;  %154 = vmatprep.subr.bf16.mxu0 %v655_v5  ;;  %v663_v10 = vld [vmem:[%s933_s3 + $0x20] ss:$8 sps:$4 sm:$0xff]   ;;  %v664_v11 = vld [vmem:[%s934_s2 + $0x24] ss:$8 sps:$4 sm:$0xff]   ;;  %v667_v12 = vld [vmem:[%s933_s3 + $0x34] ss:$8 sps:$4 sm:$0xff]  }
   0x5   :  { %633 = vmatprep.subr.bf16.mxu1 %v768_v7  ;;  %v666_v13 = vld [vmem:[%s934_s2 + $0x20] ss:$8 sps:$4 sm:$0xff]   ;;  %v670_v14 = vld [vmem:[%s934_s2 + $0x34] ss:$8 sps:$4 sm:$0xff]   ;;  %v669_v15 = vld [vmem:[%s933_s3 + $0x30] ss:$8 sps:$4 sm:$0xff]  }
   0x6   :  { %v673_v16 = vld [vmem:[%s933_s3 + $0x44] ss:$8 sps:$4 sm:$0xff]   ;;  %v672_v17 = vld [vmem:[%s934_s2 + $0x30] ss:$8 sps:$4 sm:$0xff]   ;;  %v675_v19 = vld [vmem:[%s933_s3 + $0x40] ss:$8 sps:$4 sm:$0xff]  }
   0x7   :  { %155 = vmatpush1.bf16.msra.mxu0 %v657_v6  ;;  %v676_v18 = vld [vmem:[%s934_s2 + $0x44] ss:$8 sps:$4 sm:$0xff]   ;;  %v679_v20 = vld [vmem:[%s933_s3 + $0x54] ss:$8 sps:$4 sm:$0xff]   ;;  %v678_v21 = vld [vmem:[%s934_s2 + $0x40] ss:$8 sps:$4 sm:$0xff]  }
   0x8   :  { %156 = vmatprep.subr.bf16.mxu0 %v661_v9  ;;  %641 = vmatpush1.bf16.msra.mxu1 %v774_v8  ;;  %v682_v22 = vld [vmem:[%s934_s2 + $0x54] ss:$8 sps:$4 sm:$0xff]   ;;  %v681_v23 = vld [vmem:[%s933_s3 + $0x50] ss:$8 sps:$4 sm:$0xff]   ;;  %v685_v24 = vld [vmem:[%s933_s3 + $0x64] ss:$8 sps:$4 sm:$0xff]  }
   0x9   :  { %634 = vmatprep.subr.bf16.mxu1 %v664_v11  ;;  %v684_v25 = vld [vmem:[%s934_s2 + $0x50] ss:$8 sps:$4 sm:$0xff]   ;;  %v688_v26 = vld [vmem:[%s934_s2 + $0x64] ss:$8 sps:$4 sm:$0xff]   ;;  %v687_v27 = vld [vmem:[%s933_s3 + $0x60] ss:$8 sps:$4 sm:$0xff]  }
   0xa   :  { %v691_v28 = vld [vmem:[%s933_s3 + $0x74] ss:$8 sps:$4 sm:$0xff]   ;;  %v690_v29 = vld [vmem:[%s934_s2 + $0x60] ss:$8 sps:$4 sm:$0xff]   ;;  %v693_v31 = vld [vmem:[%s933_s3 + $0x70] ss:$8 sps:$4 sm:$0xff]  }
   0xb   :  { %157 = vmatpush1.bf16.msra.mxu0 %v663_v10  ;;  %v694_v30 = vld [vmem:[%s934_s2 + $0x74] ss:$8 sps:$4 sm:$0xff]   ;;  %v696_v32 = vld [vmem:[%s934_s2 + $0x70] ss:$8 sps:$4 sm:$0xff]   ;;  %v697_v33 = vld [vmem:[%s935_s1] sm:$0xff]  }
   0xc   :  { %158 = vmatprep.subr.bf16.mxu0 %v667_v12  ;;  %642 = vmatpush1.bf16.msra.mxu1 %v666_v13  ;;  %v698_v34 = vld [vmem:[%s936_s0 + $0x10] sm:$0xff]   ;;  %v701_v35 = vld [vmem:[%s935_s1 + $0x8] sm:$0xff]   ;;  %v699_v36 = vld [vmem:[%s936_s0 + $0x18] sm:$0xff]  }
   0xd   :  { %635 = vmatprep.subr.bf16.mxu1 %v670_v14  ;;  %v700_v37 = vld [vmem:[%s936_s0 + $0x20] sm:$0xff]   ;;  %v702_v38 = vld [vmem:[%s936_s0 + $0x28] sm:$0xff]   ;;  %v704_v40 = vld [vmem:[%s936_s0 + $0x30] sm:$0xff]  }
   0xe   :  { %v703_v39 = vld [vmem:[%s936_s0] sm:$0xff]   ;;  %v705_v41 = vld [vmem:[%s936_s0 + $0x8] sm:$0xff]   ;;  %v706_v42 = vld [vmem:[%s936_s0 + $0x38] sm:$0xff]  }
   0xf   :  { %159 = vmatpush1.bf16.msra.mxu0 %v669_v15 }
  0x10   :  { %160 = vmatprep.subr.bf16.mxu0 %v673_v16  ;;  %643 = vmatpush1.bf16.msra.mxu1 %v672_v17 }
  0x11   :  { %636 = vmatprep.subr.bf16.mxu1 %v676_v18 }
  0x13   :  { %161 = vmatpush1.bf16.msra.mxu0 %v675_v19 }
  0x14   :  { %162 = vmatprep.subr.bf16.mxu0 %v679_v20  ;;  %644 = vmatpush1.bf16.msra.mxu1 %v678_v21 }
  0x15   :  { %637 = vmatprep.subr.bf16.mxu1 %v682_v22 }
  0x17   :  { %163 = vmatpush1.bf16.msra.mxu0 %v681_v23 }
  0x18   :  { %164 = vmatprep.subr.bf16.mxu0 %v685_v24  ;;  %645 = vmatpush1.bf16.msra.mxu1 %v684_v25 }
  0x19   :  { %638 = vmatprep.subr.bf16.mxu1 %v688_v26 }
  0x1b   :  { %165 = vmatpush1.bf16.msra.mxu0 %v687_v27 }
  0x1c   :  { %166 = vmatprep.subr.bf16.mxu0 %v691_v28  ;;  %646 = vmatpush1.bf16.msra.mxu1 %v690_v29 }
  0x1d   :  { %639 = vmatprep.subr.bf16.mxu1 %v694_v30 }
  0x1f   :  { %167 = vmatpush1.bf16.msra.mxu0 %v693_v31 }
  0x20   :  { %349 = vmatprep.subr.bf16.mxu0 %v652_v3  ;;  %647 = vmatpush1.bf16.msra.mxu1 %v696_v32 }
  0x22   :  { %185 = vmatmul.mubr.bf16.vlgmr.msra.gmra.mrb[0].mxu0 %v697_v33 }
  0x23   :  { %350 = vmatpush1.bf16.msra.mxu0 %v757_v4  ;;  %194 = vmatprep.mubr.bf16.mxu0 %v707_v1  ;;  %v497_v4 = vshrl.u32 %v496_v63, 7 }
  0x24   :  { %402 = vmatmul.mubr.bf16.vlgmr.msra.gmra.mrb[0].mxu1 %v698_v34  ;;  %351 = vmatprep.subr.bf16.mxu0 %v768_v7 }
  0x25   :  { %411 = vmatprep.mubr.bf16.mxu1 %v707_v1 }
  0x27   :  { %352 = vmatpush1.bf16.msra.mxu0 %v774_v8  ;;  %v498_v8 = vsub.s32 0, %v497_v4 }
  0x28   :  { %353 = vmatprep.subr.bf16.mxu0 %v664_v11  ;;  %v494_v11 = vld [vmem:[%s937_s4] sm:$0x3] }
  0x29   :  { %v499_v23 = vrot.slane %v494_v11, %v498_v8 }
  0x2a   :  { %195 = vmatmul.mubr.bf16.gmra.mrb[4].mxu0 %v701_v35 }
  0x2b   :  { %354 = vmatpush1.bf16.msra.mxu0 %v666_v13  ;;  %381 = vmatprep.mubr.bf16.mxu0 %v707_v1  ;;  %v502_v13 = vsub.s32 1, %v497_v4 }
  0x2c   :  { %412 = vmatmul.mubr.bf16.gmra.mrb[4].mxu1 %v699_v36  ;;  %355 = vmatprep.subr.bf16.mxu0 %v670_v14 }
  0x2d   :  { %421 = vmatprep.mubr.bf16.mxu1 %v707_v1  ;;  %v503_v27 = vrot.slane %v494_v11, %v502_v13 }
  0x2f   :  { %356 = vmatpush1.bf16.msra.mxu0 %v672_v17 }
  0x30   :  { %357 = vmatprep.subr.bf16.mxu0 %v676_v18  ;;  %v514_v18 = vld [vmem:[%s938_s5] sm:$0x3] }
  0x31   :  { %v523_v33 = vrot.slane %v514_v18, %v502_v13 }
  0x33   :  { %358 = vmatpush1.bf16.msra.mxu0 %v678_v21 }
  0x34   :  { %422 = vmatmul.mubr.bf16.gmra.mrb[8].mxu1 %v700_v37  ;;  %359 = vmatprep.subr.bf16.mxu0 %v682_v22 }
  0x35   :  { %431 = vmatprep.mubr.bf16.mxu1 %v707_v1 }
  0x37   :  { %360 = vmatpush1.bf16.msra.mxu0 %v684_v25 }
  0x38   :  { %361 = vmatprep.subr.bf16.mxu0 %v688_v26 }
  0x3b   :  { %362 = vmatpush1.bf16.msra.mxu0 %v690_v29 }
  0x3c   :  { %432 = vmatmul.mubr.bf16.gmra.mrb[12].mxu1 %v702_v38  ;;  %363 = vmatprep.subr.bf16.mxu0 %v694_v30  ;;  %v519_v30 = vrot.slane %v514_v18, %v498_v8 }
  0x3d   :  { %441 = vmatprep.mubr.bf16.mxu1 %v707_v1 }
  0x3f   :  { %364 = vmatpush1.bf16.msra.mxu0 %v696_v32 }
  0x42   :  { %382 = vmatmul.mubr.bf16.vlgmr.msra.gmra.mrb[8].mxu0 %v703_v39 }
  0x43   :  { %391 = vmatprep.mubr.bf16.mxu0 %v707_v1 }
  0x44   :  { %442 = vmatmul.mubr.bf16.gmra.mrb[16].mxu1 %v704_v40 }
  0x45   :  { %451 = vmatprep.mubr.bf16.mxu1 %v707_v1 }
  0x4a   :  { %392 = vmatmul.mubr.bf16.gmra.mrb[12].mxu0 %v705_v41 }
  0x4c   :  { %452 = vmatmul.mubr.bf16.gmra.mrb[20].mxu1 %v706_v42 }
  0xf5   :  { %v186_v43 = vpop.f32.mrb[0].mxu0 }
  0xf6   :  { %v188_v44 = vpop.f32.mrb[1].mxu0 }
  0xf7   :  { %v403_v45 = vpop.f32.mrb[0].mxu1  ;;  %v190_v46 = vpop.f32.mrb[2].mxu0 }
  0xf8   :  { %v405_v47 = vpop.f32.mrb[1].mxu1  ;;  %v192_v48 = vpop.f32.mrb[3].mxu0 }
  0xf9   :  { %v407_v49 = vpop.f32.mrb[2].mxu1 }
  0xfa   :  { %v409_v50 = vpop.f32.mrb[3].mxu1 }
  0xfd   :  { %v891_v51 = vpop.f32.mrb[4].mxu0 }
  0xfe   :  { %v893_v52 = vpop.f32.mrb[5].mxu0 }
  0xff   :  { %v413_v53 = vpop.f32.mrb[4].mxu1  ;;  %v895_v54 = vpop.f32.mrb[6].mxu0 }
 0x100   :  { %v897_v55 = vpop.f32.mrb[5].mxu1  ;;  %v899_v56 = vpop.f32.mrb[7].mxu0 }
 0x101   :  { %v901_v57 = vpop.f32.mrb[6].mxu1 }
 0x102   :  { %v903_v58 = vpop.f32.mrb[7].mxu1 }
 0x107   :  { %v423_v59 = vpop.f32.mrb[8].mxu1 }
 0x108   :  { %v425_v60 = vpop.f32.mrb[9].mxu1 }
 0x109   :  { %v427_v61 = vpop.f32.mrb[10].mxu1 }
 0x10a   :  { %v429_v62 = vpop.f32.mrb[11].mxu1 }
 0x10f   :  { %v433_v0 = vpop.f32.mrb[12].mxu1 }
 0x110   :  { %v435_v1 = vpop.f32.mrb[13].mxu1 }
 0x111   :  { %v437_v2 = vpop.f32.mrb[14].mxu1 }
 0x112   :  { %v905_v3 = vpop.f32.mrb[15].mxu1 }
 0x115   :  { %v383_v5 = vpop.f32.mrb[8].mxu0 }
 0x116   :  { %v462_v6 = vmax.f32 %v383_v5, %v403_v45  ;;  %v385_v7 = vpop.f32.mrb[9].mxu0 }
 0x117   :  { %v465_v9 = vmax.f32 %v385_v7, %v405_v47  ;;  %v443_v10 = vpop.f32.mrb[16].mxu1  ;;  %v387_v12 = vpop.f32.mrb[10].mxu0 }
 0x118   :  { %v463_v14 = vmax.f32 %v462_v6, %v423_v59  ;;  %v468_v15 = vmax.f32 %v387_v12, %v407_v49  ;;  %v445_v16 = vpop.f32.mrb[17].mxu1  ;;  %v389_v17 = vpop.f32.mrb[11].mxu0 }
 0x119   :  { %v466_v19 = vmax.f32 %v465_v9, %v425_v60  ;;  %v471_v20 = vmax.f32 %v389_v17, %v409_v50  ;;  %v447_v21 = vpop.f32.mrb[18].mxu1 }
 0x11a   :  { %v464_v22 = vmax.f32 %v463_v14, %v443_v10  ;;  %v469_v24 = vmax.f32 %v468_v15, %v427_v61  ;;  %v449_v25 = vpop.f32.mrb[19].mxu1 }
 0x11b   :  { %v467_v26 = vmax.f32 %v466_v19, %v445_v16  ;;  %v472_v28 = vmax.f32 %v471_v20, %v429_v62 }
 0x11c   :  { %v486_v29 = vadd.f32 %v464_v22, %v186_v43  ;;  %v470_v31 = vmax.f32 %v469_v24, %v447_v21 }
 0x11d   :  { %v487_v32 = vadd.f32 %v467_v26, %v188_v44  ;;  %v473_v34 = vmax.f32 %v472_v28, %v449_v25  ;;  %v393_v35 = vpop.f32.mrb[12].mxu0 }
 0x11e   :  { %v506_v36 = vmul.f32 %v499_v23, %v486_v29  ;;  %v488_v37 = vadd.f32 %v470_v31, %v190_v46  ;;  %v474_v38 = vmax.f32 %v393_v35, %v413_v53  ;;  %v395_v39 = vpop.f32.mrb[13].mxu0 }
 0x11f   :  { %v507_v40 = vmul.f32 %v503_v27, %v487_v32  ;;  %v489_v41 = vadd.f32 %v473_v34, %v192_v48  ;;  %v477_v42 = vmax.f32 %v395_v39, %v897_v55  ;;  %v453_v45 = vpop.f32.mrb[20].mxu1  ;;  %v397_v47 = vpop.f32.mrb[14].mxu0 }
 0x120   :  { %v526_v49 = vadd.f32 %v519_v30, %v506_v36  ;;  %v508_v50 = vmul.f32 %v499_v23, %v488_v37  ;;  %v475_v59 = vmax.f32 %v474_v38, %v433_v0  ;;  %v480_v43 = vmax.f32 %v397_v47, %v901_v57  ;;  %v455_v60 = vpop.f32.mrb[21].mxu1  ;;  %v399_v44 = vpop.f32.mrb[15].mxu0 }
 0x121   :  { %v527_v61 = vadd.f32 %v523_v33, %v507_v40  ;;  %v509_v62 = vmul.f32 %v503_v27, %v489_v41  ;;  %v478_v63 = vmax.f32 %v477_v42, %v435_v1  ;;  %v483_v46 = vmax.f32 %v399_v44, %v903_v58  ;;  %v457_v53 = vpop.f32.mrb[22].mxu1 }
 0x122   :  { %v534_v4 = vmul.f32 0.2, %v526_v49  ;;  %v528_v5 = vadd.f32 %v519_v30, %v508_v50  ;;  %v476_v48 = vmax.f32 %v475_v59, %v453_v45  ;;  %v481_v6 = vmax.f32 %v480_v43, %v437_v2  ;;  %v459_v55 = vpop.f32.mrb[23].mxu1 }
 0x123   :  { %v535_v7 = vmul.f32 0.2, %v527_v61  ;;  %v529_v8 = vadd.f32 %v523_v33, %v509_v62  ;;  %v479_v9 = vmax.f32 %v478_v63, %v455_v60  ;;  %v484_v0 = vmax.f32 %v483_v46, %v905_v3 }
 0x124   :  { %v542_v10 = vmax.f32 %v526_v49, %v534_v4  ;;  %v536_v57 = vmul.f32 0.2, %v528_v5  ;;  %v490_v11 = vadd.f32 %v476_v48, %v891_v51  ;;  %v482_v12 = vmax.f32 %v481_v6, %v457_v53 }
 0x125   :  { %v543_v13 = vmax.f32 %v527_v61, %v535_v7  ;;  %v537_v1 = vmul.f32 0.2, %v529_v8  ;;  %v491_v58 = vadd.f32 %v479_v9, %v893_v52  ;;  %v485_v14 = vmax.f32 %v484_v0, %v459_v55 }
 0x126   :  { %v544_v15 = vmax.f32 %v528_v5, %v536_v57  ;;  %v510_v16 = vmul.f32 %v499_v23, %v490_v11  ;;  %v492_v2 = vadd.f32 %v482_v12, %v895_v54 }
 0x127   :  { %v628_v17 = vpack.c.bf16 %v543_v13, %v542_v10  ;;  %v545_v18 = vmax.f32 %v529_v8, %v537_v1  ;;  %v511_v19 = vmul.f32 %v503_v27, %v491_v58  ;;  %v493_v20 = vadd.f32 %v485_v14, %v899_v56 }
 0x128   :  { %v530_v3 = vadd.f32 %v519_v30, %v510_v16  ;;  %v512_v21 = vmul.f32 %v499_v23, %v492_v2 }
 0x129   :  { %574 = vst [vmem:[%s939_s6] sm:$0xff] %v628_v17  ;;  %v629_v51 = vpack.c.bf16 %v545_v18, %v544_v15  ;;  %v531_v22 = vadd.f32 %v523_v33, %v511_v19  ;;  %v513_v24 = vmul.f32 %v503_v27, %v493_v20 }
 0x12a   :  { %v538_v52 = vmul.f32 0.2, %v530_v3  ;;  %v532_v25 = vadd.f32 %v519_v30, %v512_v21 }
 0x12b   :  { %575 = vst [vmem:[%s939_s6 + $0x8] sm:$0xff] %v629_v51  ;;  %v539_v54 = vmul.f32 0.2, %v531_v22  ;;  %v533_v26 = vadd.f32 %v523_v33, %v513_v24 }
 0x12c   :  { %v546_v28 = vmax.f32 %v530_v3, %v538_v52  ;;  %v540_v29 = vmul.f32 0.2, %v532_v25 }
 0x12d   :  { %v547_v56 = vmax.f32 %v531_v22, %v539_v54  ;;  %v541_v31 = vmul.f32 0.2, %v533_v26 }
 0x12e   :  { %v548_v23 = vmax.f32 %v532_v25, %v540_v29 }
 0x12f   :  { %v630_v32 = vpack.c.bf16 %v547_v56, %v546_v28  ;;  %v549_v34 = vmax.f32 %v533_v26, %v541_v31 }
 0x131   :  { %576 = vst [vmem:[%s939_s6 + $0x10] sm:$0xff] %v630_v32  ;;  %v631_v27 = vpack.c.bf16 %v549_v34, %v548_v23 }
 0x133   :  { %577 = vst [vmem:[%s939_s6 + $0x18] sm:$0xff] %v631_v27 }

// kernel: dgcnn_forward.10
= control target key start
LH: loop header
LB: loop body
LE: loop exit
PB: predicated region body
PF: predicated region fallthrough
CT: control target
= control target key end

     0   :  { %s1450_s13 = smov 0   ;;  %s1452_s14 = smov 0   ;;  %s1637_s0 = inlined_call_operand.vmem [shape: bf16[2,16,64], index: 0, kind: input, shape index: {}]   ;;  %s1638_s1 = inlined_call_operand.vmem [shape: bf16[2,16,64], index: 1, kind: input, shape index: {}]   ;;  %s1639_s2 = inlined_call_operand.vmem [shape: bf16[2,16,128], index: 2, kind: input, shape index: {}]   ;;  %s1640_s3 = inlined_call_operand.vmem [shape: bf16[2,16,256], index: 3, kind: input, shape index: {}]   ;;  %s1641_s4 = inlined_call_operand.vmem [shape: bf16[64,64], index: 4, kind: input, shape index: {}]   ;;  %s1642_s5 = inlined_call_operand.vmem [shape: bf16[64,64], index: 5, kind: input, shape index: {}]   ;;  %s1643_s6 = inlined_call_operand.vmem [shape: bf16[128,64], index: 6, kind: input, shape index: {}]   ;;  %s1644_s7 = inlined_call_operand.vmem [shape: bf16[256,64], index: 7, kind: input, shape index: {}]   ;;  %s1645_s8 = inlined_call_operand.vmem [shape: f32[1,64], index: 8, kind: input, shape index: {}]   ;;  %s1646_s9 = inlined_call_operand.vmem [shape: f32[1,64], index: 9, kind: input, shape index: {}]   ;;  %s1647_s10 = inlined_call_operand.vmem [shape: f32[2,2,64], index: 10, kind: output, shape index: {}]  }
   0x1   :  { %s1454_s15 = smov 0  }
   0x2 LB: > { %s32_s16 = sadd.s32 1, %s1386_s14  ;;  %p1161_p0 = scmp.ge.s32.totalorder %s1390_s15, 1  ;;  %s1390_s15 = sphi %s1454_s15, %s20_s15   ;;  %s1386_s14 = sphi %s1452_s14, %s1649_s14   ;;  %s1382_s13 = sphi %s1450_s13, %s1648_s13  }
   0x3   : > { %p34_p1 = scmp.ge.s32.totalorder %s32_s16, 2  ;;  %p383_p2 = scmp.lt.s32.totalorder %s1390_s15, 3 }
   0x5   : > { %s1651_s16 = smov (%p34_p1, %s32_s16), 0  ;;  %p384_p3 = pnand %p1161_p0, %p383_p2 }
   0x6   : > { %v1330_v0 = vld [vmem:[%s1642_s5] sm:$0xff] (!%p384_p3)   ;;  %v1392_v1 = vmov (!%p384_p3), 0.0   ;;  %v1332_v3 = vld [vmem:[%s1642_s5 + $0x8] sm:$0xff] (!%p384_p3)   ;;  %vm1393_vm0 = vmmov (!%p384_p3), 0   ;;  %p453_p4 = scmp.lt.s32.totalorder (!%p384_p3), %s1382_s13, 1  ;;  %v1334_v5 = vld [vmem:[%s1642_s5 + $0x10] sm:$0xff] (!%p384_p3)  }
   0x7   : > { %387 = sbr.rel (%p384_p3) target bundleno = 314 (0x13a), region = 60  ;;  %1259 = vmatprep.subr.bf16.mxu0 (!%p384_p3), %v1392_v1  ;;  %1271 = vmatprep.subr.bf16.mxu1 (!%p384_p3), %v1392_v1  ;;  %v1331_v2 = vld [vmem:[%s1641_s4] sm:$0xff] (!%p384_p3)   ;;  %v1333_v4 = vld [vmem:[%s1641_s4 + $0x8] sm:$0xff] (!%p384_p3)   ;;  %v1335_v6 = vld [vmem:[%s1641_s4 + $0x10] sm:$0xff] (!%p384_p3)   ;;  %vm554_vm1 = vcmask (!%p384_p3), 523264   ;;  %vm502_vm2 = vcmask (!%p384_p3), 516096  }
   0x8   : > { %1260 = vmatpush3.bf16.msra.mxu0 (!%p384_p3), %v1330_v0  ;;  %1267 = vmatprep.mubr.msk.bf16.mxu0 (!%p384_p3), %vm1393_vm0, %v1392_v1  ;;  %v1336_v7 = vld [vmem:[%s1642_s5 + $0x18] sm:$0xff] (!%p384_p3)   ;;  %v1340_v10 = vld [vmem:[%s1644_s7 + $0x40] sm:$0xff] (!%p384_p3)   ;;  %v1343_v14 = vld [vmem:[%s1644_s7 + $0x48] sm:$0xff] (!%p384_p3)   ;;  %v1394_v38 = vmov (!%p384_p3), -inf   ;;  %504 = vst.msk [vmem:[#allocation3] sm:$0x1] (!%p384_p3), %vm502_vm2, %v1392_v1 }
   0x9   : > { %1272 = vmatpush3.bf16.msra.mxu1 (!%p384_p3), %v1331_v2  ;;  %1261 = vmatprep.subr.bf16.mxu0 (!%p384_p3), %v1392_v1  ;;  %v1337_v8 = vld [vmem:[%s1641_s4 + $0x18] sm:$0xff] (!%p384_p3)   ;;  %v1341_v12 = vld [vmem:[%s1643_s6] sm:$0xff] (!%p384_p3)   ;;  %v1344_v15 = vld [vmem:[%s1643_s6 + $0x8] sm:$0xff] (!%p384_p3)   ;;  %503 = vst.msk [vmem:[#allocation2] sm:$0x1] (!%p384_p3), %vm502_vm2, %v1394_v38  ;;  %vm1029_vm3 = vcmask (!%p384_p3), 1040384  }
   0xa   : > { %1273 = vmatprep.subr.bf16.mxu1 (!%p384_p3), %v1392_v1  ;;  %1279 = vmatprep.mubr.msk.bf16.mxu1 (!%p384_p3), %vm1393_vm0, %v1392_v1  ;;  %v1342_v13 = vld [vmem:[%s1644_s7] sm:$0xff] (!%p384_p3)   ;;  %v1345_v16 = vld [vmem:[%s1644_s7 + $0x8] sm:$0xff] (!%p384_p3)   ;;  %v1346_v17 = vld [vmem:[%s1644_s7 + $0x50] sm:$0xff] (!%p384_p3)   ;;  %vm1031_vm4 = vcmask (!%p384_p3), 517120  }
   0xb   : > { %v1347_v18 = vld [vmem:[%s1643_s6 + $0x10] sm:$0xff] (!%p384_p3)   ;;  %v1349_v20 = vld [vmem:[%s1644_s7 + $0x58] sm:$0xff] (!%p384_p3)   ;;  %v1352_v23 = vld [vmem:[%s1644_s7 + $0x60] sm:$0xff] (!%p384_p3)  }
   0xc   : > { %1262 = vmatpush3.bf16.msra.mxu0 (!%p384_p3), %v1332_v3  ;;  %v1348_v19 = vld [vmem:[%s1644_s7 + $0x10] sm:$0xff] (!%p384_p3)   ;;  %v1350_v21 = vld [vmem:[%s1643_s6 + $0x18] sm:$0xff] (!%p384_p3)   ;;  %v1353_v24 = vld [vmem:[%s1643_s6 + $0x20] sm:$0xff] (!%p384_p3)  }
   0xd   : > { %1274 = vmatpush3.bf16.msra.mxu1 (!%p384_p3), %v1333_v4  ;;  %1263 = vmatprep.subr.bf16.mxu0 (!%p384_p3), %v1392_v1  ;;  %v1351_v22 = vld [vmem:[%s1644_s7 + $0x18] sm:$0xff] (!%p384_p3)   ;;  %v1354_v25 = vld [vmem:[%s1644_s7 + $0x20] sm:$0xff] (!%p384_p3)   ;;  %v1355_v26 = vld [vmem:[%s1644_s7 + $0x68] sm:$0xff] (!%p384_p3)  }
   0xe   : > { %s1653_s13 = smov (!%p453_p4, %s1382_s13), 1  ;;  %1275 = vmatprep.subr.bf16.mxu1 %v1392_v1  ;;  %v1356_v27 = vld [vmem:[%s1643_s6 + $0x28] sm:$0xff]   ;;  %v1358_v30 = vld [vmem:[%s1644_s7 + $0x70] sm:$0xff]   ;;  %v1361_v33 = vld [vmem:[%s1644_s7 + $0x78] sm:$0xff]  }
   0xf   : > { %s1494_s27 = sshll.u32 %s1653_s13, 3  ;;  %s1217_s20 = sshll.u32 %s1653_s13, 4  ;;  %v1357_v28 = vld [vmem:[%s1644_s7 + $0x28] sm:$0xff]   ;;  %v1359_v31 = vld [vmem:[%s1643_s6 + $0x30] sm:$0xff]   ;;  %v1362_v34 = vld [vmem:[%s1643_s6 + $0x38] sm:$0xff]  }
  0x10   : > { %s470_s12 = scalar_lea.vmem %s1638_s1, %s1494_s27  ;;  %s460_s19 = scalar_lea.vmem %s1637_s0, %s1494_s27  ;;  %1264 = vmatpush3.bf16.msra.mxu0 %v1334_v5  ;;  %v1360_v32 = vld [vmem:[%s1644_s7 + $0x30] sm:$0xff]   ;;  %v1363_v35 = vld [vmem:[%s1644_s7 + $0x38] sm:$0xff]   ;;  %v1210_v59 = vld [vmem:[%s1645_s8] ss:$0 sm:$0xff] }
  0x11   : > { %1276 = vmatpush3.bf16.msra.mxu1 %v1335_v6  ;;  %1265 = vmatprep.subr.bf16.mxu0 %v1392_v1  ;;  %v1338_v9 = vld [vmem:[%s470_s12] sm:$0xff]   ;;  %s491_s30 = scalar_lea.vmem %s1640_s3, %s1217_s20  ;;  %s480_s22 = scalar_lea.vmem %s1639_s2, %s1494_s27 }
  0x12   : > { %1277 = vmatprep.subr.bf16.mxu1 %v1392_v1  ;;  %v1339_v11 = vld [vmem:[%s460_s19] sm:$0xff]   ;;  %s1170_s23 = sshll.u32 %s1653_s13, 1 }
  0x13   : > { %v1366_v29 = vld [vmem:[%s491_s30 + $0x4] ss:$8 sps:$4 sm:$0xff]   ;;  %v1364_v37 = vld [vmem:[%s491_s30] ss:$8 sps:$4 sm:$0xff]   ;;  %s496_s25 = scalar_lea.vmem %s1647_s10, %s1170_s23 }
  0x14   : > { %1266 = vmatpush3.bf16.msra.mxu0 %v1336_v7  ;;  %v1367_v36 = vld [vmem:[%s480_s22] sm:$0xff]  }
  0x15   : > { %1278 = vmatpush3.bf16.msra.mxu1 %v1337_v8  ;;  %1283 = vmatprep.subr.bf16.mxu0 %v1392_v1  ;;  %v1211_v63 = vld [vmem:[%s1646_s9] ss:$0 sm:$0xff] }
  0x16   : > { %1237 = vmatprep.subr.bf16.mxu1 %v1340_v10 }
  0x17   : > { %1268 = vmatmul.mubr.msk.bf16.vlgmr.msra.gmra.mrb[0].mxu0 %vm554_vm1, %v1338_v9 }
  0x18   : > { %1280 = vmatmul.mubr.msk.bf16.vlgmr.msra.gmra.mrb[0].mxu1 %vm554_vm1, %v1339_v11  ;;  %1284 = vmatpush3.bf16.msra.mxu0 %v1341_v12 }
  0x19   : > { %1238 = vmatpush3.bf16.msra.mxu1 %v1342_v13  ;;  %1285 = vmatprep.subr.bf16.mxu0 %v1392_v1 }
  0x1a   : > { %1239 = vmatprep.subr.bf16.mxu1 %v1343_v14  ;;  %1299 = vmatprep.mubr.msk.bf16.mxu0 %vm1393_vm0, %v1392_v1 }
  0x1b   : > { %959 = vmatprep.mubr.bf16.mxu1 %v1366_v29 }
  0x1c   : > { %1286 = vmatpush3.bf16.msra.mxu0 %v1344_v15 }
  0x1d   : > { %1240 = vmatpush3.bf16.msra.mxu1 %v1345_v16  ;;  %1287 = vmatprep.subr.bf16.mxu0 %v1392_v1 }
  0x1e   : > { %1241 = vmatprep.subr.bf16.mxu1 %v1346_v17 }
  0x20   : > { %1288 = vmatpush3.bf16.msra.mxu0 %v1347_v18 }
  0x21   : > { %1242 = vmatpush3.bf16.msra.mxu1 %v1348_v19  ;;  %1289 = vmatprep.subr.bf16.mxu0 %v1392_v1 }
  0x22   : > { %1243 = vmatprep.subr.bf16.mxu1 %v1349_v20 }
  0x24   : > { %1290 = vmatpush3.bf16.msra.mxu0 %v1350_v21 }
  0x25   : > { %1244 = vmatpush3.bf16.msra.mxu1 %v1351_v22  ;;  %1291 = vmatprep.subr.bf16.mxu0 %v1392_v1 }
  0x26   : > { %1245 = vmatprep.subr.bf16.mxu1 %v1352_v23 }
  0x28   : > { %1292 = vmatpush3.bf16.msra.mxu0 %v1353_v24 }
  0x29   : > { %1246 = vmatpush3.bf16.msra.mxu1 %v1354_v25  ;;  %1293 = vmatprep.subr.bf16.mxu0 %v1392_v1  ;;  %v992_v25 = vld [vmem:[#allocation2] sm:$0x1] }
  0x2a   : > { %1247 = vmatprep.subr.bf16.mxu1 %v1355_v26  ;;  %v1005_v26 = vld [vmem:[#allocation3] sm:$0x1] }
  0x2c   : > { %1294 = vmatpush3.bf16.msra.mxu0 %v1356_v27 }
  0x2d   : > { %1248 = vmatpush3.bf16.msra.mxu1 %v1357_v28  ;;  %1295 = vmatprep.subr.bf16.mxu0 %v1392_v1 }
  0x2e   : > { %1249 = vmatprep.subr.bf16.mxu1 %v1358_v30 }
  0x30   : > { %1296 = vmatpush3.bf16.msra.mxu0 %v1359_v31  ;;  %v1024_v31 = vlaneseq }
  0x31   : > { %1250 = vmatpush3.bf16.msra.mxu1 %v1360_v32  ;;  %1297 = vmatprep.subr.bf16.mxu0 %v1392_v1 }
  0x32   : > { %1251 = vmatprep.subr.bf16.mxu1 %v1361_v33  ;;  %v1025_v32 = vshrl.u32 %v1024_v31, 7 }
  0x34   : > { %1298 = vmatpush3.bf16.msra.mxu0 %v1362_v34  ;;  %v1026_v33 = vsub.s32 0, %v1025_v32 }
  0x35   : > { %1252 = vmatpush3.bf16.msra.mxu1 %v1363_v35 }
  0x37   : > { %1300 = vmatmul.mubr.bf16.vlgmr.msra.gmra.mrb[4].mxu0 %v1367_v36 }
  0x38   : > { %960 = vmatmul.mubr.bf16.vlgmr.msra.gmra.mrb[4].mxu1 %v1364_v37 }
  0xea   : > { %v592_v39 = vpop.f32.mrb[0].mxu0 }
  0xeb   : > { %v665_v40 = vpop.f32.mrb[0].mxu1  ;;  %v1269_v41 = vpop.f32.mrb[1].mxu0 }
  0xec   : > { %v666_v42 = vadd.f32 %v665_v40, %v592_v39  ;;  %v1281_v43 = vpop.f32.mrb[1].mxu1  ;;  %v595_v44 = vpop.f32.mrb[2].mxu0 }
  0xed   : > { %v668_v45 = vpop.f32.mrb[2].mxu1  ;;  %v1270_v46 = vpop.f32.mrb[3].mxu0 }
  0xee   : > { %v669_v47 = vadd.f32 %v668_v45, %v595_v44  ;;  %v1282_v48 = vpop.f32.mrb[3].mxu1 }
 0x10a   : > { %v778_v49 = vpop.f32.mrb[4].mxu0 }
 0x10b   : > { %v785_v50 = vadd.f32 %v778_v49, %v666_v42  ;;  %v1253_v51 = vpop.f32.mrb[4].mxu1  ;;  %v1301_v52 = vpop.f32.mrb[5].mxu0 }
 0x10c   : > { %v1254_v53 = vpop.f32.mrb[5].mxu1  ;;  %v781_v54 = vpop.f32.mrb[6].mxu0 }
 0x10d   : > { %v1255_v55 = vadd.f32 %v1254_v53, %v1253_v51  ;;  %v786_v56 = vadd.f32 %v781_v54, %v669_v47  ;;  %v1256_v57 = vpop.f32.mrb[6].mxu1  ;;  %v1302_v58 = vpop.f32.mrb[7].mxu0 }
 0x10e   : > { %v1257_v60 = vpop.f32.mrb[7].mxu1 }
 0x10f   : > { %v968_v61 = vadd.f32 %v1255_v55, %v785_v50  ;;  %v1258_v62 = vadd.f32 %v1257_v60, %v1256_v57 }
 0x111   : > { %v977_v0 = vmul.f32 %v1210_v59, %v968_v61  ;;  %v969_v1 = vadd.f32 %v1258_v62, %v786_v56 }
 0x113   : > { %v986_v2 = vadd.f32 %v1211_v63, %v977_v0  ;;  %v978_v3 = vmul.f32 %v1210_v59, %v969_v1 }
 0x115   : > { %v988_v4 = vmul.f32 0.2, %v986_v2  ;;  %v987_v5 = vadd.f32 %v1211_v63, %v978_v3 }
 0x117   : > { %v990_v6 = vmax.f32 %v986_v2, %v988_v4  ;;  %v989_v7 = vmul.f32 0.2, %v987_v5 }
 0x119   : > { %v991_v8 = vmax.f32 %v987_v5, %v989_v7  ;;  %v993_v9 = vsel %vm554_vm1, %v990_v6, -inf  ;;  %v1006_v10 = vsel %vm554_vm1, %v990_v6, 0.0 }
 0x11b   : > { %v994_v11 = vsel %vm554_vm1, %v991_v8, -inf  ;;  %v1007_v12 = vsel %vm554_vm1, %v991_v8, 0.0 }
 0x11c   : > { %v995_v13 = vmax.f32 %v993_v9, %v994_v11  ;;  %v1008_v14 = vadd.f32 %v1007_v12, %v1006_v10 }
 0x11e   : > { %v996_v15 = vrot.slane %v995_v13, 4  ;;  %v1009_v16 = vrot.slane %v1008_v14, 4 }
 0x120   : > { %v997_v17 = vmax.f32 %v995_v13, %v996_v15  ;;  %v1010_v18 = vadd.f32 %v1009_v16, %v1008_v14 }
 0x122   : > { %v998_v19 = vrot.slane %v997_v17, 2  ;;  %v1011_v20 = vrot.slane %v1010_v18, 2 }
 0x124   : > { %v999_v21 = vmax.f32 %v997_v17, %v998_v19  ;;  %v1012_v22 = vadd.f32 %v1011_v20, %v1010_v18 }
 0x126   : > { %v1000_v23 = vrot.slane %v999_v21, 1  ;;  %v1013_v24 = vrot.slane %v1012_v22, 1 }
 0x128   : > { %v1001_v27 = vmax.f32 %v999_v21, %v1000_v23  ;;  %v1014_v28 = vadd.f32 %v1013_v24, %v1012_v22 }
 0x12a   : > { %v1002_v29 = vmax.f32 %v992_v25, %v1001_v27  ;;  %v1015_v30 = vadd.f32 %v1014_v28, %v1005_v26 }
 0x12c   : > { %1004 = vst.msk [vmem:[#allocation2] sm:$0x1] %vm502_vm2, %v1002_v29  ;;  %1016 = vst.msk [vmem:[#allocation3] sm:$0x1] %vm502_vm2, %v1015_v30 }
 0x133   : > { %v1021_v34 = vld [vmem:[#allocation3] sm:$0x1]  ;;  %v1020_v37 = vld [vmem:[#allocation2] sm:$0x1] }
 0x134   : > { %v1022_v35 = vmul.f32 0.0625, %v1021_v34 }
 0x136   : > { %v1027_v36 = vrot.slane %v1022_v35, %v1026_v33 }
 0x138   : > { %v1030_v38 = vsel %vm1029_vm3, %v1020_v37, %v1027_v36 }
 0x139   : > { %1032 = vst.msk [vmem:[%s496_s25] sm:$0x3] %vm1031_vm4, %v1030_v38 }
 0x13a PF: > { %s20_s15 = sadd.s32 1, %s1390_s15   ;;  %s1648_s13 = smov %s1386_s14 }
 0x13b   : > { %p17_p5 = scmp.ge.s32.totalorder %s20_s15, 4   ;;  %s1649_s14 = smov %s1651_s16 }
 0x13d   :  { %19 = sbr.rel (!%p17_p5) target bundleno = 2 (0x2), region = 107 }

// kernel: dgcnn_forward.11
= control target key start
LH: loop header
LB: loop body
LE: loop exit
PB: predicated region body
PF: predicated region fallthrough
CT: control target
= control target key end

     0   :  { %v1389_v2 = vmov 0   ;;  %s1847_s0 = inlined_call_operand.vmem [shape: bf16[2,128], index: 0, kind: input, shape index: {}]   ;;  %s1848_s1 = inlined_call_operand.vmem [shape: bf16[128,512], index: 1, kind: input, shape index: {}]   ;;  %s1849_s2 = inlined_call_operand.vmem [shape: f32[1,512], index: 2, kind: input, shape index: {}]   ;;  %s1850_s3 = inlined_call_operand.vmem [shape: f32[1,512], index: 3, kind: input, shape index: {}]   ;;  %s1851_s4 = inlined_call_operand.vmem [shape: bf16[512,256], index: 4, kind: input, shape index: {}]   ;;  %s1852_s5 = inlined_call_operand.vmem [shape: f32[1,256], index: 5, kind: input, shape index: {}]   ;;  %s1853_s6 = inlined_call_operand.vmem [shape: f32[1,256], index: 6, kind: input, shape index: {}]   ;;  %s1854_s7 = inlined_call_operand.vmem [shape: bf16[256,40], index: 7, kind: input, shape index: {}]   ;;  %s1855_s8 = inlined_call_operand.vmem [shape: f32[1,40], index: 8, kind: input, shape index: {}]   ;;  %s1856_s9 = inlined_call_operand.hbm [shape: f32[2,40], index: 9, kind: output, shape index: {}]  }
   0x1   :  { %v1205_v0 = vld [vmem:[%s1848_s1 + $0x4] ss:$16 sps:$4 sm:$0xff]   ;;  %v1207_v1 = vld [vmem:[%s1848_s1] ss:$16 sps:$4 sm:$0xff]   ;;  %259 = vmatprep.mubr.bf16.mxu1 %v1389_v2  ;;  %v1231_v22 = vld [vmem:[%s1848_s1 + $0xc] ss:$16 sps:$4 sm:$0xff]  }
   0x2   :  { %227 = vmatprep.subr.bf16.mxu1 %v1205_v0  ;;  %v1208_v3 = vld [vmem:[%s1848_s1 + $0x24] ss:$16 sps:$4 sm:$0xff]   ;;  %v1210_v4 = vld [vmem:[%s1848_s1 + $0x20] ss:$16 sps:$4 sm:$0xff]   ;;  %v1229_v26 = vld [vmem:[%s1848_s1 + $0x8] ss:$16 sps:$4 sm:$0xff]  }
   0x3   :  { %228 = vmatpush1.bf16.msra.mxu1 %v1207_v1  ;;  %v1211_v5 = vld [vmem:[%s1848_s1 + $0x44] ss:$16 sps:$4 sm:$0xff]   ;;  %v1213_v6 = vld [vmem:[%s1848_s1 + $0x40] ss:$16 sps:$4 sm:$0xff]   ;;  %v1234_v27 = vld [vmem:[%s1848_s1 + $0x2c] ss:$16 sps:$4 sm:$0xff]  }
   0x4   :  { %229 = vmatprep.subr.bf16.mxu1 %v1208_v3  ;;  %v1214_v7 = vld [vmem:[%s1848_s1 + $0x64] ss:$16 sps:$4 sm:$0xff]   ;;  %v1216_v8 = vld [vmem:[%s1848_s1 + $0x60] ss:$16 sps:$4 sm:$0xff]   ;;  %v1232_v30 = vld [vmem:[%s1848_s1 + $0x28] ss:$16 sps:$4 sm:$0xff]  }
   0x5   :  { %v1217_v9 = vld [vmem:[%s1848_s1 + $0x84] ss:$16 sps:$4 sm:$0xff]   ;;  %v1219_v10 = vld [vmem:[%s1848_s1 + $0x80] ss:$16 sps:$4 sm:$0xff]   ;;  %v1237_v31 = vld [vmem:[%s1848_s1 + $0x4c] ss:$16 sps:$4 sm:$0xff]  }
   0x6   :  { %v1220_v11 = vld [vmem:[%s1848_s1 + $0xa4] ss:$16 sps:$4 sm:$0xff]   ;;  %v1222_v12 = vld [vmem:[%s1848_s1 + $0xa0] ss:$16 sps:$4 sm:$0xff]   ;;  %v1235_v32 = vld [vmem:[%s1848_s1 + $0x48] ss:$16 sps:$4 sm:$0xff]  }
   0x7   :  { %230 = vmatpush1.bf16.msra.mxu1 %v1210_v4  ;;  %v1223_v13 = vld [vmem:[%s1848_s1 + $0xc4] ss:$16 sps:$4 sm:$0xff]   ;;  %v1225_v14 = vld [vmem:[%s1848_s1 + $0xc0] ss:$16 sps:$4 sm:$0xff]   ;;  %v1240_v34 = vld [vmem:[%s1848_s1 + $0x6c] ss:$16 sps:$4 sm:$0xff]  }
   0x8   :  { %231 = vmatprep.subr.bf16.mxu1 %v1211_v5  ;;  %v1253_v15 = vld [vmem:[%s1851_s4 + $0x4] ss:$8 sps:$4 sm:$0xff]   ;;  %v1255_v16 = vld [vmem:[%s1851_s4] ss:$8 sps:$4 sm:$0xff]   ;;  %v1256_v17 = vld [vmem:[%s1851_s4 + $0x14] ss:$8 sps:$4 sm:$0xff]  }
   0x9   :  { %v1226_v18 = vld [vmem:[%s1848_s1 + $0xe4] ss:$16 sps:$4 sm:$0xff]   ;;  %757 = vmatprep.subr.bf16.mxu0 %v1253_v15  ;;  %v1258_v19 = vld [vmem:[%s1851_s4 + $0x10] ss:$8 sps:$4 sm:$0xff]   ;;  %v1261_v23 = vld [vmem:[%s1851_s4 + $0x20] ss:$8 sps:$4 sm:$0xff]  }
   0xa   :  { %758 = vmatpush1.bf16.msra.mxu0 %v1255_v16  ;;  %v1259_v20 = vld [vmem:[%s1851_s4 + $0x24] ss:$8 sps:$4 sm:$0xff]   ;;  %v1228_v21 = vld [vmem:[%s1848_s1 + $0xe0] ss:$16 sps:$4 sm:$0xff]   ;;  %v1262_v25 = vld [vmem:[%s1851_s4 + $0x34] ss:$8 sps:$4 sm:$0xff]  }
   0xb   :  { %232 = vmatpush1.bf16.msra.mxu1 %v1213_v6  ;;  %759 = vmatprep.subr.bf16.mxu0 %v1256_v17  ;;  %v1513_v24 = vld [vmem:[%s1847_s0] sm:$0x1]  ;;  %v1264_v28 = vld [vmem:[%s1851_s4 + $0x30] ss:$8 sps:$4 sm:$0xff]   ;;  %v1265_v29 = vld [vmem:[%s1851_s4 + $0x44] ss:$8 sps:$4 sm:$0xff]  }
   0xc   :  { %233 = vmatprep.subr.bf16.mxu1 %v1214_v7  ;;  %v1267_v33 = vld [vmem:[%s1851_s4 + $0x40] ss:$8 sps:$4 sm:$0xff]   ;;  %v1268_v35 = vld [vmem:[%s1851_s4 + $0x54] ss:$8 sps:$4 sm:$0xff]   ;;  %v1270_v36 = vld [vmem:[%s1851_s4 + $0x50] ss:$8 sps:$4 sm:$0xff]  }
   0xd   :  { %v1271_v37 = vld [vmem:[%s1851_s4 + $0x64] ss:$8 sps:$4 sm:$0xff]   ;;  %v1238_v38 = vld [vmem:[%s1848_s1 + $0x68] ss:$16 sps:$4 sm:$0xff]   ;;  %v1274_v41 = vld [vmem:[%s1851_s4 + $0x74] ss:$8 sps:$4 sm:$0xff]  }
   0xe   :  { %760 = vmatpush1.bf16.msra.mxu0 %v1258_v19  ;;  %v1243_v39 = vld [vmem:[%s1848_s1 + $0x8c] ss:$16 sps:$4 sm:$0xff]   ;;  %v1273_v40 = vld [vmem:[%s1851_s4 + $0x60] ss:$8 sps:$4 sm:$0xff]   ;;  %v1276_v44 = vld [vmem:[%s1851_s4 + $0x70] ss:$8 sps:$4 sm:$0xff]  }
   0xf   :  { %234 = vmatpush1.bf16.msra.mxu1 %v1216_v8  ;;  %761 = vmatprep.subr.bf16.mxu0 %v1259_v20  ;;  %v1241_v42 = vld [vmem:[%s1848_s1 + $0x88] ss:$16 sps:$4 sm:$0xff]   ;;  %v1246_v43 = vld [vmem:[%s1848_s1 + $0xac] ss:$16 sps:$4 sm:$0xff]  }
  0x10   :  { %235 = vmatprep.subr.bf16.mxu1 %v1217_v9  ;;  %v1277_v45 = vld [vmem:[%s1851_s4 + $0x84] ss:$8 sps:$4 sm:$0xff]   ;;  %v1244_v46 = vld [vmem:[%s1848_s1 + $0xa8] ss:$16 sps:$4 sm:$0xff]   ;;  %v1280_v49 = vld [vmem:[%s1851_s4 + $0x94] ss:$8 sps:$4 sm:$0xff]  }
  0x11   :  { %v1249_v47 = vld [vmem:[%s1848_s1 + $0xcc] ss:$16 sps:$4 sm:$0xff]   ;;  %v1279_v48 = vld [vmem:[%s1851_s4 + $0x80] ss:$8 sps:$4 sm:$0xff]   ;;  %v1282_v52 = vld [vmem:[%s1851_s4 + $0x90] ss:$8 sps:$4 sm:$0xff]  }
  0x12   :  { %762 = vmatpush1.bf16.msra.mxu0 %v1261_v23  ;;  %v1247_v50 = vld [vmem:[%s1848_s1 + $0xc8] ss:$16 sps:$4 sm:$0xff]   ;;  %v1252_v51 = vld [vmem:[%s1848_s1 + $0xec] ss:$16 sps:$4 sm:$0xff]  }
  0x13   :  { %236 = vmatpush1.bf16.msra.mxu1 %v1219_v10  ;;  %763 = vmatprep.subr.bf16.mxu0 %v1262_v25  ;;  %v1283_v53 = vld [vmem:[%s1851_s4 + $0xa4] ss:$8 sps:$4 sm:$0xff]   ;;  %v1250_v54 = vld [vmem:[%s1848_s1 + $0xe8] ss:$16 sps:$4 sm:$0xff]   ;;  %v1286_v56 = vld [vmem:[%s1851_s4 + $0xb4] ss:$8 sps:$4 sm:$0xff]  }
  0x14   :  { %237 = vmatprep.subr.bf16.mxu1 %v1220_v11  ;;  %v1285_v55 = vld [vmem:[%s1851_s4 + $0xa0] ss:$8 sps:$4 sm:$0xff]  }
  0x16   :  { %764 = vmatpush1.bf16.msra.mxu0 %v1264_v28 }
  0x17   :  { %238 = vmatpush1.bf16.msra.mxu1 %v1222_v12  ;;  %765 = vmatprep.subr.bf16.mxu0 %v1265_v29 }
  0x18   :  { %239 = vmatprep.subr.bf16.mxu1 %v1223_v13 }
  0x1a   :  { %766 = vmatpush1.bf16.msra.mxu0 %v1267_v33 }
  0x1b   :  { %240 = vmatpush1.bf16.msra.mxu1 %v1225_v14  ;;  %767 = vmatprep.subr.bf16.mxu0 %v1268_v35 }
  0x1c   :  { %241 = vmatprep.subr.bf16.mxu1 %v1226_v18 }
  0x1e   :  { %768 = vmatpush1.bf16.msra.mxu0 %v1270_v36 }
  0x1f   :  { %242 = vmatpush1.bf16.msra.mxu1 %v1228_v21  ;;  %769 = vmatprep.subr.bf16.mxu0 %v1271_v37 }
  0x20   :  { %268 = vmatprep.subr.bf16.mxu1 %v1231_v22 }
  0x22   :  { %260 = vmatmul.mubr.bf16.vlgmr.msra.gmra.mrb[0].mxu1 %v1513_v24  ;;  %770 = vmatpush1.bf16.msra.mxu0 %v1273_v40 }
  0x23   :  { %269 = vmatpush1.bf16.msra.mxu1 %v1229_v26  ;;  %300 = vmatprep.mubr.bf16.mxu1 %v1389_v2 }
  0x24   :  { %270 = vmatprep.subr.bf16.mxu1 %v1234_v27  ;;  %771 = vmatprep.subr.bf16.mxu0 %v1274_v41 }
  0x26   :  { %772 = vmatpush1.bf16.msra.mxu0 %v1276_v44 }
  0x27   :  { %271 = vmatpush1.bf16.msra.mxu1 %v1232_v30  ;;  %773 = vmatprep.subr.bf16.mxu0 %v1277_v45 }
  0x28   :  { %272 = vmatprep.subr.bf16.mxu1 %v1237_v31 }
  0x2a   :  { %774 = vmatpush1.bf16.msra.mxu0 %v1279_v48 }
  0x2b   :  { %273 = vmatpush1.bf16.msra.mxu1 %v1235_v32  ;;  %775 = vmatprep.subr.bf16.mxu0 %v1280_v49 }
  0x2c   :  { %274 = vmatprep.subr.bf16.mxu1 %v1240_v34 }
  0x2e   :  { %776 = vmatpush1.bf16.msra.mxu0 %v1282_v52 }
  0x2f   :  { %275 = vmatpush1.bf16.msra.mxu1 %v1238_v38  ;;  %777 = vmatprep.subr.bf16.mxu0 %v1283_v53 }
  0x30   :  { %276 = vmatprep.subr.bf16.mxu1 %v1243_v39 }
  0x33   :  { %277 = vmatpush1.bf16.msra.mxu1 %v1241_v42 }
  0x34   :  { %278 = vmatprep.subr.bf16.mxu1 %v1246_v43 }
  0x37   :  { %279 = vmatpush1.bf16.msra.mxu1 %v1244_v46 }
  0x38   :  { %280 = vmatprep.subr.bf16.mxu1 %v1249_v47 }
  0x3b   :  { %281 = vmatpush1.bf16.msra.mxu1 %v1247_v50 }
  0x3c   :  { %282 = vmatprep.subr.bf16.mxu1 %v1252_v51 }
  0x3d   :  { %14 = vsyncpa [#allocation3], 0  ;;  %778 = vmatpush1.bf16.msra.mxu0 %v1285_v55  ;;  %v1288_v57 = vld [vmem:[%s1851_s4 + $0xb0] ss:$8 sps:$4 sm:$0xff]   ;;  %v1289_v58 = vld [vmem:[%s1851_s4 + $0xc4] ss:$8 sps:$4 sm:$0xff]   ;;  %v311_v3 = vlaneseq }
  0x3e   :  { %779 = vmatprep.subr.bf16.mxu0 %v1286_v56  ;;  %v1291_v59 = vld [vmem:[%s1851_s4 + $0xc0] ss:$8 sps:$4 sm:$0xff]   ;;  %v1292_v60 = vld [vmem:[%s1851_s4 + $0xd4] ss:$8 sps:$4 sm:$0xff]   ;;  %v1294_v61 = vld [vmem:[%s1851_s4 + $0xd0] ss:$8 sps:$4 sm:$0xff]  }
  0x3f   :  { %283 = vmatpush1.bf16.msra.mxu1 %v1250_v54  ;;  %v1295_v62 = vld [vmem:[%s1851_s4 + $0xe4] ss:$8 sps:$4 sm:$0xff]   ;;  %v1297_v63 = vld [vmem:[%s1851_s4 + $0xe0] ss:$8 sps:$4 sm:$0xff]   ;;  %v1298_v0 = vld [vmem:[%s1851_s4 + $0xf4] ss:$8 sps:$4 sm:$0xff]  }
  0x40   :  { %v1300_v1 = vld [vmem:[%s1851_s4 + $0xf0] ss:$8 sps:$4 sm:$0xff]   ;;  %v1303_v2 = vld [vmem:[%s1851_s4 + $0x104] ss:$8 sps:$4 sm:$0xff]   ;;  %v1643_v4 = vshrl.u32 %v311_v3, 7  ;;  %vm1048_vm0 = vcmask 320512  }
  0x41   :  { %780 = vmatpush1.bf16.msra.mxu0 %v1288_v57  ;;  %v1649_v6 = vld [vmem:[%s1849_s2] sm:$0xf]  ;;  %v1351_v12 = vld [vmem:[%s1854_s7 + $0x48] sm:$0xff]   ;;  %v1353_v14 = vld [vmem:[%s1854_s7 + $0x50] sm:$0xff]  }
  0x42   :  { %301 = vmatmul.mubr.bf16.vlgmr.msra.gmra.mrb[4].mxu1 %v1513_v24  ;;  %781 = vmatprep.subr.bf16.mxu0 %v1289_v58  ;;  %v321_v5 = vsub.s32 2, %v1643_v4  ;;  %v1654_v7 = vld [vmem:[%s1850_s3] sm:$0xf]  ;;  %v1352_v13 = vld [vmem:[%s1854_s7 + $0x8] sm:$0xff]   ;;  %v1354_v15 = vld [vmem:[%s1854_s7 + $0x10] sm:$0xff]   ;;  %v1693_v20 = vsub.s32 0, %v1643_v4 }
  0x43   :  { %v1349_v10 = vld [vmem:[%s1854_s7 + $0x40] sm:$0xff]   ;;  %v1355_v16 = vld [vmem:[%s1854_s7 + $0x58] sm:$0xff]   ;;  %v1696_v21 = vsub.s32 1, %v1643_v4  ;;  %v325_v49 = vsub.s32 3, %v1643_v4 }
  0x44   :  { %v1657_v8 = vrot.slane %v1649_v6, %v321_v5  ;;  %v1660_v9 = vrot.slane %v1654_v7, %v321_v5  ;;  %v1350_v11 = vld [vmem:[%s1854_s7] sm:$0xff]   ;;  %1177 = vmatprep.subr.bf16.mxu1 %v1349_v10  ;;  %v1356_v17 = vld [vmem:[%s1854_s7 + $0x18] sm:$0xff]   ;;  %v314_v22 = vrot.slane %v1649_v6, %v1693_v20  ;;  %v340_v24 = vrot.slane %v1654_v7, %v1693_v20 }
  0x45   :  { %782 = vmatpush1.bf16.msra.mxu0 %v1291_v59  ;;  %1178 = vmatpush3.bf16.msra.mxu1 %v1350_v11  ;;  %v1357_v18 = vld [vmem:[%s1854_s7 + $0x60] sm:$0xff]   ;;  %v318_v23 = vrot.slane %v1649_v6, %v1696_v21  ;;  %v344_v26 = vrot.slane %v1654_v7, %v1696_v21  ;;  %v1306_v41 = vld [vmem:[%s1851_s4 + $0x114] ss:$8 sps:$4 sm:$0xff]   ;;  %v1304_v42 = vld [vmem:[%s1851_s4 + $0x110] ss:$8 sps:$4 sm:$0xff]   ;;  %v326_v52 = vrot.slane %v1649_v6, %v325_v49 }
  0x46   :  { %783 = vmatprep.subr.bf16.mxu0 %v1292_v60  ;;  %1179 = vmatprep.subr.bf16.mxu1 %v1351_v12  ;;  %v1358_v19 = vld [vmem:[%s1854_s7 + $0x20] sm:$0xff]   ;;  %v1312_v45 = vld [vmem:[%s1851_s4 + $0x134] ss:$8 sps:$4 sm:$0xff]   ;;  %v1310_v46 = vld [vmem:[%s1851_s4 + $0x130] ss:$8 sps:$4 sm:$0xff]   ;;  %v352_v55 = vrot.slane %v1654_v7, %v325_v49 }
  0x47   :  { %v1301_v39 = vld [vmem:[%s1851_s4 + $0x100] ss:$8 sps:$4 sm:$0xff]   ;;  %v1309_v43 = vld [vmem:[%s1851_s4 + $0x124] ss:$8 sps:$4 sm:$0xff]   ;;  %v1318_v50 = vld [vmem:[%s1851_s4 + $0x154] ss:$8 sps:$4 sm:$0xff]  }
  0x48   :  { %v1307_v44 = vld [vmem:[%s1851_s4 + $0x120] ss:$8 sps:$4 sm:$0xff]   ;;  %v1315_v47 = vld [vmem:[%s1851_s4 + $0x144] ss:$8 sps:$4 sm:$0xff]   ;;  %v1316_v51 = vld [vmem:[%s1851_s4 + $0x150] ss:$8 sps:$4 sm:$0xff]  }
  0x49   :  { %784 = vmatpush1.bf16.msra.mxu0 %v1294_v61  ;;  %1180 = vmatpush3.bf16.msra.mxu1 %v1352_v13  ;;  %v1313_v48 = vld [vmem:[%s1851_s4 + $0x140] ss:$8 sps:$4 sm:$0xff]   ;;  %v1321_v53 = vld [vmem:[%s1851_s4 + $0x164] ss:$8 sps:$4 sm:$0xff]   ;;  %v1324_v61 = vld [vmem:[%s1851_s4 + $0x174] ss:$8 sps:$4 sm:$0xff]  }
  0x4a   :  { %785 = vmatprep.subr.bf16.mxu0 %v1295_v62  ;;  %1181 = vmatprep.subr.bf16.mxu1 %v1353_v14  ;;  %v1319_v58 = vld [vmem:[%s1851_s4 + $0x160] ss:$8 sps:$4 sm:$0xff]   ;;  %v1327_v3 = vld [vmem:[%s1851_s4 + $0x184] ss:$8 sps:$4 sm:$0xff]   ;;  %v1330_v7 = vld [vmem:[%s1851_s4 + $0x194] ss:$8 sps:$4 sm:$0xff]  }
  0x4b   :  { %v1325_v5 = vld [vmem:[%s1851_s4 + $0x180] ss:$8 sps:$4 sm:$0xff]   ;;  %v1336_v11 = vld [vmem:[%s1851_s4 + $0x1b4] ss:$8 sps:$4 sm:$0xff]   ;;  %v1334_v12 = vld [vmem:[%s1851_s4 + $0x1b0] ss:$8 sps:$4 sm:$0xff]  }
  0x4c   :  { %v1331_v10 = vld [vmem:[%s1851_s4 + $0x1a0] ss:$8 sps:$4 sm:$0xff]   ;;  %v1339_v13 = vld [vmem:[%s1851_s4 + $0x1c4] ss:$8 sps:$4 sm:$0xff]  }
  0x4d   :  { %786 = vmatpush1.bf16.msra.mxu0 %v1297_v63  ;;  %1182 = vmatpush3.bf16.msra.mxu1 %v1354_v15  ;;  %v1337_v14 = vld [vmem:[%s1851_s4 + $0x1c0] ss:$8 sps:$4 sm:$0xff]   ;;  %v1342_v15 = vld [vmem:[%s1851_s4 + $0x1d4] ss:$8 sps:$4 sm:$0xff]  }
  0x4e   :  { %787 = vmatprep.subr.bf16.mxu0 %v1298_v0  ;;  %1183 = vmatprep.subr.bf16.mxu1 %v1355_v16  ;;  %v1340_v16 = vld [vmem:[%s1851_s4 + $0x1d0] ss:$8 sps:$4 sm:$0xff]  }
  0x51   :  { %788 = vmatpush1.bf16.msra.mxu0 %v1300_v1  ;;  %1184 = vmatpush3.bf16.msra.mxu1 %v1356_v17  ;;  %v1322_v1 = vld [vmem:[%s1851_s4 + $0x170] ss:$8 sps:$4 sm:$0xff]   ;;  %v1345_v17 = vld [vmem:[%s1851_s4 + $0x1e4] ss:$8 sps:$4 sm:$0xff]  }
  0x52   :  { %798 = vmatprep.subr.bf16.mxu0 %v1303_v2  ;;  %1185 = vmatprep.subr.bf16.mxu1 %v1357_v18  ;;  %v1343_v18 = vld [vmem:[%s1851_s4 + $0x1e0] ss:$8 sps:$4 sm:$0xff]  }
  0x55   :  { %1186 = vmatpush3.bf16.msra.mxu1 %v1358_v19 }
  0xf5   :  { %v261_v25 = vpop.f32.mrb[0].mxu1 }
  0xf6   :  { %v331_v27 = vmul.f32 %v314_v22, %v261_v25  ;;  %v263_v28 = vpop.f32.mrb[1].mxu1  ;;  %v1348_v22 = vld [vmem:[%s1851_s4 + $0x1f4] ss:$8 sps:$4 sm:$0xff]  }
  0xf7   :  { %v332_v29 = vmul.f32 %v318_v23, %v263_v28  ;;  %v265_v30 = vpop.f32.mrb[2].mxu1  ;;  %v1346_v23 = vld [vmem:[%s1851_s4 + $0x1f0] ss:$8 sps:$4 sm:$0xff]  }
  0xf8   :  { %v357_v31 = vadd.f32 %v340_v24, %v331_v27  ;;  %v266_v32 = vpop.f32.mrb[3].mxu1  ;;  %v1360_v27 = vld [vmem:[%s1854_s7 + $0x28] sm:$0xff]   ;;  %v1361_v28 = vld [vmem:[%s1854_s7 + $0x70] sm:$0xff]   ;;  %v1363_v30 = vld [vmem:[%s1854_s7 + $0x78] sm:$0xff]  }
  0xf9   :  { %v358_v33 = vadd.f32 %v344_v26, %v332_v29  ;;  %v1359_v26 = vld [vmem:[%s1854_s7 + $0x68] sm:$0xff]   ;;  %v1362_v29 = vld [vmem:[%s1854_s7 + $0x30] sm:$0xff]   ;;  %v839_v32 = vld [vmem:[%s1852_s5] sm:$0x3] }
  0xfa   :  { %v361_v34 = vmul.f32 0.2, %v357_v31  ;;  %1187 = vmatprep.subr.bf16.mxu1 %v1359_v26 }
  0xfb   :  { %v362_v35 = vmul.f32 0.2, %v358_v33  ;;  %1188 = vmatpush3.bf16.msra.mxu1 %v1360_v27 }
  0xfc   :  { %v365_v36 = vmax.f32 %v357_v31, %v361_v34  ;;  %1189 = vmatprep.subr.bf16.mxu1 %v1361_v28  ;;  %v1364_v31 = vld [vmem:[%s1854_s7 + $0x38] sm:$0xff]   ;;  %v844_v34 = vrot.slane %v839_v32, %v1693_v20  ;;  %s1390_s7 = smov [#allocation2]  }
  0xfd   :  { %v366_v37 = vmax.f32 %v358_v33, %v362_v35  ;;  %v853_v33 = vld [vmem:[%s1853_s6] sm:$0x3]  ;;  %v848_v35 = vrot.slane %v839_v32, %v1696_v21  ;;  %s1056_s11 = sshll.u32 %s1390_s7, 4  ;;  %s1057_s11 = int_to_ptr.vmem [resolvable:$true] %s1056_s11 }
  0xfe   :  { %v369_v40 = vpack.c.bf16 %v365_v36, %v365_v36  ;;  %v858_v36 = vrot.slane %v853_v33, %v1693_v20  ;;  %v1160_v20 = vld [vmem:[%s1855_s8] ss:$0 sm:$0xff]  ;;  %s1365_s12 = scalar_lea.vmem %s1057_s11, 32  ;;  %p1370_p1 = scmp.lt.s32.totalorder %s1057_s11, %s1057_s11 }
  0xff   :  { %v370_v38 = vpack.c.bf16 %v366_v37, %v366_v37  ;;  %1190 = vmatpush3.bf16.msra.mxu1 %v1362_v29  ;;  %p1366_p0 = scmp.ne.s32.totalorder %s1057_s11, %s1365_s12  ;;  %p1371_p2 = scmp.lt.s32.totalorder %s1365_s12, %s1365_s12 }
 0x100   :  { %1191 = vmatprep.subr.bf16.mxu1 %v1363_v30 }
 0x101   :  { %789 = vmatprep.mubr.bf16.mxu0 %v370_v38  ;;  %v862_v38 = vrot.slane %v853_v33, %v1696_v21  ;;  %p1372_p3 = por %p1371_p2, %p1370_p1 }
 0x102   :  { %790 = vmatmul.mubr.bf16.vlgmr.msra.gmra.mrb[0].mxu0 %v369_v40 }
 0x103   :  { %799 = vmatpush1.bf16.msra.mxu0 %v1301_v39  ;;  %1192 = vmatpush3.bf16.msra.mxu1 %v1364_v31  ;;  %p1373_p4 = pnand %p1372_p3, %p1366_p0 }
 0x104   :  { %800 = vmatprep.subr.bf16.mxu0 %v1306_v41 }
 0x107   :  { %801 = vmatpush1.bf16.msra.mxu0 %v1304_v42 }
 0x108   :  { %802 = vmatprep.subr.bf16.mxu0 %v1309_v43 }
 0x10b   :  { %803 = vmatpush1.bf16.msra.mxu0 %v1307_v44 }
 0x10c   :  { %804 = vmatprep.subr.bf16.mxu0 %v1312_v45 }
 0x10f   :  { %805 = vmatpush1.bf16.msra.mxu0 %v1310_v46 }
 0x110   :  { %806 = vmatprep.subr.bf16.mxu0 %v1315_v47 }
 0x113   :  { %807 = vmatpush1.bf16.msra.mxu0 %v1313_v48 }
 0x114   :  { %808 = vmatprep.subr.bf16.mxu0 %v1318_v50 }
 0x115   :  { %v302_v54 = vpop.f32.mrb[4].mxu1 }
 0x116   :  { %v333_v56 = vmul.f32 %v1657_v8, %v302_v54  ;;  %v304_v57 = vpop.f32.mrb[5].mxu1  ;;  %v1328_v8 = vld [vmem:[%s1851_s4 + $0x190] ss:$8 sps:$4 sm:$0xff]  }
 0x117   :  { %809 = vmatpush1.bf16.msra.mxu0 %v1316_v51  ;;  %v334_v59 = vmul.f32 %v326_v52, %v304_v57  ;;  %v306_v60 = vpop.f32.mrb[6].mxu1 }
 0x118   :  { %810 = vmatprep.subr.bf16.mxu0 %v1321_v53  ;;  %v359_v62 = vadd.f32 %v1660_v9, %v333_v56  ;;  %v307_v63 = vpop.f32.mrb[7].mxu1  ;;  %v1333_v9 = vld [vmem:[%s1851_s4 + $0x1a4] ss:$8 sps:$4 sm:$0xff]  }
 0x119   :  { %v360_v0 = vadd.f32 %v352_v55, %v334_v59 }
 0x11a   :  { %v363_v19 = vmul.f32 0.2, %v359_v62 }
 0x11b   :  { %811 = vmatpush1.bf16.msra.mxu0 %v1319_v58  ;;  %v364_v2 = vmul.f32 0.2, %v360_v0 }
 0x11c   :  { %812 = vmatprep.subr.bf16.mxu0 %v1324_v61  ;;  %v367_v24 = vmax.f32 %v359_v62, %v363_v19 }
 0x11d   :  { %v368_v4 = vmax.f32 %v360_v0, %v364_v2 }
 0x11e   :  { %v371_v25 = vpack.c.bf16 %v367_v24, %v367_v24 }
 0x11f   :  { %813 = vmatpush1.bf16.msra.mxu0 %v1322_v1  ;;  %v372_v6 = vpack.c.bf16 %v368_v4, %v368_v4 }
 0x120   :  { %814 = vmatprep.subr.bf16.mxu0 %v1327_v3 }
 0x121   :  { %830 = vmatprep.mubr.bf16.mxu0 %v372_v6 }
 0x123   :  { %815 = vmatpush1.bf16.msra.mxu0 %v1325_v5 }
 0x124   :  { %816 = vmatprep.subr.bf16.mxu0 %v1330_v7 }
 0x127   :  { %817 = vmatpush1.bf16.msra.mxu0 %v1328_v8 }
 0x128   :  { %818 = vmatprep.subr.bf16.mxu0 %v1333_v9 }
 0x12b   :  { %819 = vmatpush1.bf16.msra.mxu0 %v1331_v10 }
 0x12c   :  { %820 = vmatprep.subr.bf16.mxu0 %v1336_v11 }
 0x12f   :  { %821 = vmatpush1.bf16.msra.mxu0 %v1334_v12 }
 0x130   :  { %822 = vmatprep.subr.bf16.mxu0 %v1339_v13 }
 0x133   :  { %823 = vmatpush1.bf16.msra.mxu0 %v1337_v14 }
 0x134   :  { %824 = vmatprep.subr.bf16.mxu0 %v1342_v15 }
 0x137   :  { %825 = vmatpush1.bf16.msra.mxu0 %v1340_v16 }
 0x138   :  { %826 = vmatprep.subr.bf16.mxu0 %v1345_v17 }
 0x13b   :  { %827 = vmatpush1.bf16.msra.mxu0 %v1343_v18 }
 0x13c   :  { %828 = vmatprep.subr.bf16.mxu0 %v1348_v22 }
 0x13f   :  { %829 = vmatpush1.bf16.msra.mxu0 %v1346_v23 }
 0x142   :  { %831 = vmatmul.mubr.bf16.vlgmr.msra.gmra.mrb[0].mxu0 %v371_v25 }
 0x215   :  { %v832_v37 = vpop.f32.mrb[0].mxu0 }
 0x216   :  { %v851_v39 = vmul.f32 %v844_v34, %v832_v37  ;;  %v834_v40 = vpop.f32.mrb[1].mxu0 }
 0x217   :  { %v852_v41 = vmul.f32 %v848_v35, %v834_v40  ;;  %v836_v42 = vpop.f32.mrb[2].mxu0 }
 0x218   :  { %v865_v43 = vadd.f32 %v858_v36, %v851_v39  ;;  %v837_v44 = vpop.f32.mrb[3].mxu0 }
 0x219   :  { %v866_v45 = vadd.f32 %v862_v38, %v852_v41 }
 0x21a   :  { %v867_v46 = vmul.f32 0.2, %v865_v43 }
 0x21b   :  { %v868_v47 = vmul.f32 0.2, %v866_v45 }
 0x21c   :  { %v869_v48 = vmax.f32 %v865_v43, %v867_v46 }
 0x21d   :  { %v870_v49 = vmax.f32 %v866_v45, %v868_v47 }
 0x21e   :  { %v871_v51 = vpack.c.bf16 %v869_v48, %v869_v48 }
 0x21f   :  { %v872_v50 = vpack.c.bf16 %v870_v49, %v870_v49 }
 0x221   :  { %1040 = vmatprep.mubr.bf16.mxu1 %v872_v50 }
 0x222   :  { %1041 = vmatmul.mubr.bf16.vlgmr.msra.gmra.mrb[8].mxu1 %v871_v51 }
 0x2f5   :  { %v1193_v52 = vpop.f32.mrb[8].mxu1 }
 0x2f6   :  { %v1194_v21 = vpop.f32.mrb[9].mxu1 }
 0x2f7   :  { %v1195_v53 = vadd.f32 %v1194_v21, %v1193_v52  ;;  %v1196_v54 = vpop.f32.mrb[10].mxu1 }
 0x2f8   :  { %v1197_v55 = vpop.f32.mrb[11].mxu1 }
 0x2f9   :  { %v1043_v56 = vadd.f32 %v1195_v53, %v1160_v20 }
 0x2fb   :  { %1049 = vst.msk [vmem:[#allocation2] sm:$0x3] %vm1048_vm0, %v1043_v56 }
 0x2fc   :  { %1376 = shalt.err (!%p1373_p4)
}
 0x2fd   :  { %s1377_s8 = scalar_lea.hbm %s1856_s9, 32 }
 0x2fe   :  { %p1378_p5 = scmp.ne.s32.totalorder %s1856_s9, %s1377_s8  ;;  %p1381_p6 = scmp.lt.u32.totalorder %s1377_s8, %s1856_s9 }
 0x300   :  { %p1383_p7 = pnand %p1381_p6, %p1378_p5 }
 0x302   :  { %1386 = shalt.err (!%p1383_p7)
}
 0x303   :  { %1059 = dma.vmem_to_hbm [thread:$0]  %s1057_s11, 32, %s1856_s9, [#allocation3]  }
 0x304   :  { %1387 = dma.done.wait [#allocation3], 32  }
 0x305   :  { %1388 = vsyncadd [#allocation3], 4294967264 }
 0x306   :  { %1063 = vsyncpa [#allocation3], 1 }

</bundles_post_ra>
